<compile_context>
chip_gen: v6e
topology: v6e:2x2x1
jax: 0.10.0
libtpu: 0.0.40
codegen_flags: <defaults>
</compile_context>

<pallas_src>
import functools

import jax
import jax.numpy as jnp
from jax.experimental import pallas as pl
from jax.experimental.pallas import tpu as pltpu

EPS = 1e-5


def _unit_resnet_kernel(*refs, N, H, W, C, K, use_hw_map):
    """Whole-network kernel in channel-major, lane-dense layout.

    Inputs (in order, hw map only when use_hw_map):
      hw_ref  : (2, L)      optional precomputed per-lane (h, w) coordinates
      x_ref   : (N, C, HW)  input activations (f32), free reshape of NCHW
      wX_ref  : (K*K, C, C) per-tap conv weights (bf16), tap t = kh*K + kw
      gX/beX  : (C, 1)      BN gamma / beta (f32)
      out_ref : (N, C, HW)  output (f32)
    """
    if use_hw_map:
        (hw_ref, x_ref, w1_ref, g1_ref, be1_ref,
         w2_ref, g2_ref, be2_ref, out_ref) = refs
    else:
        (x_ref, w1_ref, g1_ref, be1_ref,
         w2_ref, g2_ref, be2_ref, out_ref) = refs
        hw_ref = None

    P = K // 2
    HW = H * W
    L = N * HW

    # Lane-coordinate vectors (h, w of every lane), resident across both convs.
    # Lane p decodes to (n, h, w) with h = (p % HW) // W, w = p % W.
    if use_hw_map:
        hh = jnp.broadcast_to(hw_ref[0:1, :], (C, L))
        ww = jnp.broadcast_to(hw_ref[1:2, :], (C, L))
    else:
        pos = jax.lax.broadcasted_iota(jnp.int32, (C, L), 1)
        ww = pos & (W - 1)
        hh = (pos & (HW - 1)) >> (W.bit_length() - 1)

    def conv(y, w_ref):
        # K*K accumulating per-tap MXU matmuls straight off the rolled+masked
        # taps -- no im2col scratch, no patch assembly.  Masks are built inline
        # (4 compares + 3 ands) so they never stay live past the tap.
        # TODO(synk): if a bundle dump shows the XLU (rolls + BN reductions)
        # saturating, move the BN sum/sumsq onto the idle MXU (ones-vector dot).
        acc = None
        for kh in range(K):
            for kw in range(K):
                dh, dw = kh - P, kw - P
                if dh == 0 and dw == 0:
                    tap = y
                else:
                    d = dh * W + dw          # output lane p reads source lane p + d
                    rolled = pltpu.roll(y, shift=(-d) % L, axis=1)
                    mask = ((hh + dh >= 0) & (hh + dh < H) &
                            (ww + dw >= 0) & (ww + dw < W))
                    tap = jnp.where(mask, rolled, 0.0)
                part = jnp.dot(w_ref[kh * K + kw], tap.astype(jnp.bfloat16),
                               preferred_element_type=jnp.float32)
                acc = part if acc is None else acc + part
        return acc

    def bn(y, g_ref, be_ref):
        # Training-mode BatchNorm2d: per-channel mean / biased variance over
        # (N, H, W) == the lane axis.  One-pass sum / sum-of-squares in f32 is
        # fine at this L / tolerance; prefer two-pass statistics when tiling to
        # very large L (cancellation risk).
        inv_l = 1.0 / L
        mean = jnp.sum(y, axis=1, keepdims=True) * inv_l
        msq = jnp.sum(y * y, axis=1, keepdims=True) * inv_l
        var = msq - mean * mean
        scale = g_ref[...] * jax.lax.rsqrt(var + EPS)
        return y * scale + (be_ref[...] - mean * scale)

    # Assemble the lane-dense (C, L) working layout from the (N, C, HW) input:
    # a lane-aligned in-register concat, no HBM transpose anywhere.
    parts = [x_ref[n] for n in range(N)]
    x = parts[0] if N == 1 else jnp.concatenate(parts, axis=1)

    y1 = jnp.maximum(bn(conv(x, w1_ref), g1_ref, be1_ref), 0.0)   # conv1->bn1->relu
    y2 = bn(conv(y1, w2_ref), g2_ref, be2_ref)                    # conv2->bn2
    y = y2 + x                                                    # + residual (UnitResNet)

    for n in range(N):                                            # split back to (N, C, HW)
        out_ref[n] = y[:, n * HW:(n + 1) * HW]


def unit_resnet_forward(x_nchw, params):
    """Pallas implementation of UnitResNet.forward.  Input/output are NCHW."""
    N, C, H, W = x_nchw.shape
    K = params["K"]
    HW = H * W
    L = N * HW

    # Free, contiguous reshape (NO HBM transpose): NCHW -> (N, C, H*W).
    x_in = x_nchw.reshape(N, C, HW).astype(jnp.float32)
    # TODO(synk): optionally pass x / emit the output in bf16 to halve HBM
    # traffic for the scaled-up version (BN stats and residual stay f32).

    def to_taps(w_oihw):
        # (O, I, Kh, Kw) -> (K*K, O, I): per-tap (C_out, C_in) bf16 matrices.
        return jnp.transpose(w_oihw, (2, 3, 0, 1)).reshape(K * K, C, C).astype(jnp.bfloat16)

    pow2 = (W & (W - 1)) == 0 and (HW & (HW - 1)) == 0
    extra = ()
    if not pow2:
        # Precompute the per-lane (h, w) map outside the kernel so it never
        # runs vector integer div/mod.
        p = jnp.arange(L, dtype=jnp.int32)
        extra = (jnp.stack([(p % HW) // W, p % W], axis=0).astype(jnp.int32),)

    # Conv biases b1/b2 are intentionally NOT passed: training-mode BN mean
    # subtraction cancels them exactly (the reference keeps them and matches).
    args = extra + (
        x_in,
        to_taps(params["w1"]),
        params["g1"].reshape(C, 1).astype(jnp.float32),
        params["be1"].reshape(C, 1).astype(jnp.float32),
        to_taps(params["w2"]),
        params["g2"].reshape(C, 1).astype(jnp.float32),
        params["be2"].reshape(C, 1).astype(jnp.float32),
    )

    kernel = functools.partial(_unit_resnet_kernel, N=N, H=H, W=W, C=C, K=K,
                               use_hw_map=not pow2)
    vmem = pl.BlockSpec(memory_space=pltpu.MemorySpace.VMEM)

    out = pl.pallas_call(
        kernel,
        out_shape=jax.ShapeDtypeStruct((N, C, HW), jnp.float32),
        in_specs=[vmem] * len(args),
        out_specs=vmem,
    )(*args)

    return out.reshape(N, C, H, W)


def unit_resnet_ref(x, params):
    """Pure-JAX reference (NCHW), mirrors the PyTorch module in training mode."""
    K = params["K"]
    P = K // 2

    def conv(x, w, b):
        y = jax.lax.conv_general_dilated(
            x, w, (1, 1), [(P, P), (P, P)],
            dimension_numbers=("NCHW", "OIHW", "NCHW"),
            precision=jax.lax.Precision.HIGHEST)
        return y + b[None, :, None, None]

    def bn(y, g, be):
        mean = jnp.mean(y, axis=(0, 2, 3), keepdims=True)
        var = jnp.mean((y - mean) ** 2, axis=(0, 2, 3), keepdims=True)
        yn = (y - mean) / jnp.sqrt(var + EPS)
        return yn * g[None, :, None, None] + be[None, :, None, None]

    y = jnp.maximum(bn(conv(x, params["w1"], params["b1"]),
                       params["g1"], params["be1"]), 0.0)
    y = bn(conv(y, params["w2"], params["b2"]), params["g2"], params["be2"])
    return y + x   # UnitResNet.forward: layers(x) + x (no outer ReLU)


if __name__ == "__main__":
    N, C, H, W, K = 2, 4, 16, 16, 3

    key = jax.random.PRNGKey(0)
    ks = jax.random.split(key, 9)
    params = dict(
        K=K,
        w1=0.1 * jax.random.normal(ks[0], (C, C, K, K), jnp.float32),
        b1=0.1 * jax.random.normal(ks[1], (C,), jnp.float32),
        g1=1.0 + 0.1 * jax.random.normal(ks[2], (C,), jnp.float32),
        be1=0.1 * jax.random.normal(ks[3], (C,), jnp.float32),
        w2=0.1 * jax.random.normal(ks[4], (C, C, K, K), jnp.float32),
        b2=0.1 * jax.random.normal(ks[5], (C,), jnp.float32),
        g2=1.0 + 0.1 * jax.random.normal(ks[6], (C,), jnp.float32),
        be2=0.1 * jax.random.normal(ks[7], (C,), jnp.float32),
    )
    x = jax.random.normal(ks[8], (N, C, H, W), jnp.float32)

    out = jax.block_until_ready(unit_resnet_forward(x, params))
    ref = jax.block_until_ready(unit_resnet_ref(x, params))

    assert out.shape == x.shape, (out.shape, x.shape)
    max_err = float(jnp.max(jnp.abs(out - ref)))
    assert jnp.allclose(out, ref, atol=5e-2, rtol=5e-2), f"max abs err={max_err}"
    print("KERNEL_OK")
</pallas_src>

<mosaic_0001>
module attributes {stable_mosaic.version = 11 : i64} {
  func.func @_unit_resnet_kernel(%arg0: memref<2x4x256xf32, #tpu.memory_space<vmem>>, %arg1: memref<9x4x4xbf16, #tpu.memory_space<vmem>>, %arg2: memref<4x1xf32, #tpu.memory_space<vmem>>, %arg3: memref<4x1xf32, #tpu.memory_space<vmem>>, %arg4: memref<9x4x4xbf16, #tpu.memory_space<vmem>>, %arg5: memref<4x1xf32, #tpu.memory_space<vmem>>, %arg6: memref<4x1xf32, #tpu.memory_space<vmem>>, %arg7: memref<2x4x256xf32, #tpu.memory_space<vmem>>) attributes {dimension_semantics = [], scalar_prefetch = 0 : i64, scratch_operands = 0 : i64, tpu.core_type = #tpu.core_type<tc>} {
    %0 = tpu.iota {dimensions = array<i32: 1>} : vector<4x512xi32>
    %c15_i32 = arith.constant 15 : i32
    %1 = vector.broadcast %c15_i32 : i32 to vector<4x512xi32>
    %2 = arith.andi %0, %1 : vector<4x512xi32>
    %c255_i32 = arith.constant 255 : i32
    %3 = vector.broadcast %c255_i32 : i32 to vector<4x512xi32>
    %4 = arith.andi %0, %3 : vector<4x512xi32>
    %c4_i32 = arith.constant 4 : i32
    %5 = vector.broadcast %c4_i32 : i32 to vector<4x512xi32>
    %6 = arith.shrsi %4, %5 : vector<4x512xi32>
    %c0 = arith.constant 0 : index
    %c0_0 = arith.constant 0 : index
    %c0_1 = arith.constant 0 : index
    %7 = vector.load %arg0[%c0, %c0_0, %c0_1] : memref<2x4x256xf32, #tpu.memory_space<vmem>>, vector<1x4x256xf32>
    %8 = vector.shape_cast %7 : vector<1x4x256xf32> to vector<4x256xf32>
    %c1 = arith.constant 1 : index
    %c0_2 = arith.constant 0 : index
    %c0_3 = arith.constant 0 : index
    %9 = vector.load %arg0[%c1, %c0_2, %c0_3] : memref<2x4x256xf32, #tpu.memory_space<vmem>>, vector<1x4x256xf32>
    %10 = vector.shape_cast %9 : vector<1x4x256xf32> to vector<4x256xf32>
    %11 = tpu.concatenate %8, %10 in 1 : vector<4x256xf32>, vector<4x256xf32> -> vector<4x512xf32>
    %c17_i32 = arith.constant 17 : i32
    %12 = tpu.dynamic_rotate %11 by %c17_i32 dim 1 : vector<4x512xf32>, i32 -> vector<4x512xf32>
    %c-1_i32 = arith.constant -1 : i32
    %13 = vector.broadcast %c-1_i32 : i32 to vector<4x512xi32>
    %14 = arith.addi %6, %13 : vector<4x512xi32>
    %c0_i32 = arith.constant 0 : i32
    %15 = vector.broadcast %c0_i32 : i32 to vector<4x512xi32>
    %16 = arith.cmpi sge, %14, %15 : vector<4x512xi32>
    %c-1_i32_4 = arith.constant -1 : i32
    %17 = vector.broadcast %c-1_i32_4 : i32 to vector<4x512xi32>
    %18 = arith.addi %6, %17 : vector<4x512xi32>
    %c16_i32 = arith.constant 16 : i32
    %19 = vector.broadcast %c16_i32 : i32 to vector<4x512xi32>
    %20 = arith.cmpi slt, %18, %19 : vector<4x512xi32>
    %21 = arith.andi %16, %20 : vector<4x512xi1>
    %c-1_i32_5 = arith.constant -1 : i32
    %22 = vector.broadcast %c-1_i32_5 : i32 to vector<4x512xi32>
    %23 = arith.addi %2, %22 : vector<4x512xi32>
    %c0_i32_6 = arith.constant 0 : i32
    %24 = vector.broadcast %c0_i32_6 : i32 to vector<4x512xi32>
    %25 = arith.cmpi sge, %23, %24 : vector<4x512xi32>
    %26 = arith.andi %21, %25 : vector<4x512xi1>
    %c-1_i32_7 = arith.constant -1 : i32
    %27 = vector.broadcast %c-1_i32_7 : i32 to vector<4x512xi32>
    %28 = arith.addi %2, %27 : vector<4x512xi32>
    %c16_i32_8 = arith.constant 16 : i32
    %29 = vector.broadcast %c16_i32_8 : i32 to vector<4x512xi32>
    %30 = arith.cmpi slt, %28, %29 : vector<4x512xi32>
    %31 = arith.andi %26, %30 : vector<4x512xi1>
    %cst = arith.constant 0.000000e+00 : f32
    %32 = vector.broadcast %cst : f32 to vector<4x512xf32>
    %33 = arith.select %31, %12, %32 : vector<4x512xi1>, vector<4x512xf32>
    %c0_9 = arith.constant 0 : index
    %c0_10 = arith.constant 0 : index
    %c0_11 = arith.constant 0 : index
    %34 = vector.load %arg1[%c0_9, %c0_10, %c0_11] : memref<9x4x4xbf16, #tpu.memory_space<vmem>>, vector<1x4x4xbf16>
    %35 = vector.shape_cast %34 : vector<1x4x4xbf16> to vector<4x4xbf16>
    %36 = arith.truncf %33 : vector<4x512xf32> to vector<4x512xbf16>
    %cst_12 = arith.constant dense<0.000000e+00> : vector<4x512xf32>
    %37 = tpu.matmul %35, %36, %cst_12 {dimension_numbers = #tpu.dot_dimension_numbers<[1], [0], [0], [1], [0, 0, 1, 1], [], []>} : vector<4x4xbf16>, vector<4x512xbf16>, vector<4x512xf32> -> vector<4x512xf32>
    %c16_i32_13 = arith.constant 16 : i32
    %38 = tpu.dynamic_rotate %11 by %c16_i32_13 dim 1 : vector<4x512xf32>, i32 -> vector<4x512xf32>
    %c-1_i32_14 = arith.constant -1 : i32
    %39 = vector.broadcast %c-1_i32_14 : i32 to vector<4x512xi32>
    %40 = arith.addi %6, %39 : vector<4x512xi32>
    %c0_i32_15 = arith.constant 0 : i32
    %41 = vector.broadcast %c0_i32_15 : i32 to vector<4x512xi32>
    %42 = arith.cmpi sge, %40, %41 : vector<4x512xi32>
    %c-1_i32_16 = arith.constant -1 : i32
    %43 = vector.broadcast %c-1_i32_16 : i32 to vector<4x512xi32>
    %44 = arith.addi %6, %43 : vector<4x512xi32>
    %c16_i32_17 = arith.constant 16 : i32
    %45 = vector.broadcast %c16_i32_17 : i32 to vector<4x512xi32>
    %46 = arith.cmpi slt, %44, %45 : vector<4x512xi32>
    %47 = arith.andi %42, %46 : vector<4x512xi1>
    %c0_i32_18 = arith.constant 0 : i32
    %48 = vector.broadcast %c0_i32_18 : i32 to vector<4x512xi32>
    %49 = arith.addi %2, %48 : vector<4x512xi32>
    %c0_i32_19 = arith.constant 0 : i32
    %50 = vector.broadcast %c0_i32_19 : i32 to vector<4x512xi32>
    %51 = arith.cmpi sge, %49, %50 : vector<4x512xi32>
    %52 = arith.andi %47, %51 : vector<4x512xi1>
    %c0_i32_20 = arith.constant 0 : i32
    %53 = vector.broadcast %c0_i32_20 : i32 to vector<4x512xi32>
    %54 = arith.addi %2, %53 : vector<4x512xi32>
    %c16_i32_21 = arith.constant 16 : i32
    %55 = vector.broadcast %c16_i32_21 : i32 to vector<4x512xi32>
    %56 = arith.cmpi slt, %54, %55 : vector<4x512xi32>
    %57 = arith.andi %52, %56 : vector<4x512xi1>
    %cst_22 = arith.constant 0.000000e+00 : f32
    %58 = vector.broadcast %cst_22 : f32 to vector<4x512xf32>
    %59 = arith.select %57, %38, %58 : vector<4x512xi1>, vector<4x512xf32>
    %c1_23 = arith.constant 1 : index
    %c0_24 = arith.constant 0 : index
    %c0_25 = arith.constant 0 : index
    %60 = vector.load %arg1[%c1_23, %c0_24, %c0_25] : memref<9x4x4xbf16, #tpu.memory_space<vmem>>, vector<1x4x4xbf16>
    %61 = vector.shape_cast %60 : vector<1x4x4xbf16> to vector<4x4xbf16>
    %62 = arith.truncf %59 : vector<4x512xf32> to vector<4x512xbf16>
    %cst_26 = arith.constant dense<0.000000e+00> : vector<4x512xf32>
    %63 = tpu.matmul %61, %62, %cst_26 {dimension_numbers = #tpu.dot_dimension_numbers<[1], [0], [0], [1], [0, 0, 1, 1], [], []>} : vector<4x4xbf16>, vector<4x512xbf16>, vector<4x512xf32> -> vector<4x512xf32>
    %64 = arith.addf %37, %63 : vector<4x512xf32>
    %c15_i32_27 = arith.constant 15 : i32
    %65 = tpu.dynamic_rotate %11 by %c15_i32_27 dim 1 : vector<4x512xf32>, i32 -> vector<4x512xf32>
    %c-1_i32_28 = arith.constant -1 : i32
    %66 = vector.broadcast %c-1_i32_28 : i32 to vector<4x512xi32>
    %67 = arith.addi %6, %66 : vector<4x512xi32>
    %c0_i32_29 = arith.constant 0 : i32
    %68 = vector.broadcast %c0_i32_29 : i32 to vector<4x512xi32>
    %69 = arith.cmpi sge, %67, %68 : vector<4x512xi32>
    %c-1_i32_30 = arith.constant -1 : i32
    %70 = vector.broadcast %c-1_i32_30 : i32 to vector<4x512xi32>
    %71 = arith.addi %6, %70 : vector<4x512xi32>
    %c16_i32_31 = arith.constant 16 : i32
    %72 = vector.broadcast %c16_i32_31 : i32 to vector<4x512xi32>
    %73 = arith.cmpi slt, %71, %72 : vector<4x512xi32>
    %74 = arith.andi %69, %73 : vector<4x512xi1>
    %c1_i32 = arith.constant 1 : i32
    %75 = vector.broadcast %c1_i32 : i32 to vector<4x512xi32>
    %76 = arith.addi %2, %75 : vector<4x512xi32>
    %c0_i32_32 = arith.constant 0 : i32
    %77 = vector.broadcast %c0_i32_32 : i32 to vector<4x512xi32>
    %78 = arith.cmpi sge, %76, %77 : vector<4x512xi32>
    %79 = arith.andi %74, %78 : vector<4x512xi1>
    %c1_i32_33 = arith.constant 1 : i32
    %80 = vector.broadcast %c1_i32_33 : i32 to vector<4x512xi32>
    %81 = arith.addi %2, %80 : vector<4x512xi32>
    %c16_i32_34 = arith.constant 16 : i32
    %82 = vector.broadcast %c16_i32_34 : i32 to vector<4x512xi32>
    %83 = arith.cmpi slt, %81, %82 : vector<4x512xi32>
    %84 = arith.andi %79, %83 : vector<4x512xi1>
    %cst_35 = arith.constant 0.000000e+00 : f32
    %85 = vector.broadcast %cst_35 : f32 to vector<4x512xf32>
    %86 = arith.select %84, %65, %85 : vector<4x512xi1>, vector<4x512xf32>
    %c2 = arith.constant 2 : index
    %c0_36 = arith.constant 0 : index
    %c0_37 = arith.constant 0 : index
    %87 = vector.load %arg1[%c2, %c0_36, %c0_37] : memref<9x4x4xbf16, #tpu.memory_space<vmem>>, vector<1x4x4xbf16>
    %88 = vector.shape_cast %87 : vector<1x4x4xbf16> to vector<4x4xbf16>
    %89 = arith.truncf %86 : vector<4x512xf32> to vector<4x512xbf16>
    %cst_38 = arith.constant dense<0.000000e+00> : vector<4x512xf32>
    %90 = tpu.matmul %88, %89, %cst_38 {dimension_numbers = #tpu.dot_dimension_numbers<[1], [0], [0], [1], [0, 0, 1, 1], [], []>} : vector<4x4xbf16>, vector<4x512xbf16>, vector<4x512xf32> -> vector<4x512xf32>
    %91 = arith.addf %64, %90 : vector<4x512xf32>
    %c1_i32_39 = arith.constant 1 : i32
    %92 = tpu.dynamic_rotate %11 by %c1_i32_39 dim 1 : vector<4x512xf32>, i32 -> vector<4x512xf32>
    %c0_i32_40 = arith.constant 0 : i32
    %93 = vector.broadcast %c0_i32_40 : i32 to vector<4x512xi32>
    %94 = arith.addi %6, %93 : vector<4x512xi32>
    %c0_i32_41 = arith.constant 0 : i32
    %95 = vector.broadcast %c0_i32_41 : i32 to vector<4x512xi32>
    %96 = arith.cmpi sge, %94, %95 : vector<4x512xi32>
    %c0_i32_42 = arith.constant 0 : i32
    %97 = vector.broadcast %c0_i32_42 : i32 to vector<4x512xi32>
    %98 = arith.addi %6, %97 : vector<4x512xi32>
    %c16_i32_43 = arith.constant 16 : i32
    %99 = vector.broadcast %c16_i32_43 : i32 to vector<4x512xi32>
    %100 = arith.cmpi slt, %98, %99 : vector<4x512xi32>
    %101 = arith.andi %96, %100 : vector<4x512xi1>
    %c-1_i32_44 = arith.constant -1 : i32
    %102 = vector.broadcast %c-1_i32_44 : i32 to vector<4x512xi32>
    %103 = arith.addi %2, %102 : vector<4x512xi32>
    %c0_i32_45 = arith.constant 0 : i32
    %104 = vector.broadcast %c0_i32_45 : i32 to vector<4x512xi32>
    %105 = arith.cmpi sge, %103, %104 : vector<4x512xi32>
    %106 = arith.andi %101, %105 : vector<4x512xi1>
    %c-1_i32_46 = arith.constant -1 : i32
    %107 = vector.broadcast %c-1_i32_46 : i32 to vector<4x512xi32>
    %108 = arith.addi %2, %107 : vector<4x512xi32>
    %c16_i32_47 = arith.constant 16 : i32
    %109 = vector.broadcast %c16_i32_47 : i32 to vector<4x512xi32>
    %110 = arith.cmpi slt, %108, %109 : vector<4x512xi32>
    %111 = arith.andi %106, %110 : vector<4x512xi1>
    %cst_48 = arith.constant 0.000000e+00 : f32
    %112 = vector.broadcast %cst_48 : f32 to vector<4x512xf32>
    %113 = arith.select %111, %92, %112 : vector<4x512xi1>, vector<4x512xf32>
    %c3 = arith.constant 3 : index
    %c0_49 = arith.constant 0 : index
    %c0_50 = arith.constant 0 : index
    %114 = vector.load %arg1[%c3, %c0_49, %c0_50] : memref<9x4x4xbf16, #tpu.memory_space<vmem>>, vector<1x4x4xbf16>
    %115 = vector.shape_cast %114 : vector<1x4x4xbf16> to vector<4x4xbf16>
    %116 = arith.truncf %113 : vector<4x512xf32> to vector<4x512xbf16>
    %cst_51 = arith.constant dense<0.000000e+00> : vector<4x512xf32>
    %117 = tpu.matmul %115, %116, %cst_51 {dimension_numbers = #tpu.dot_dimension_numbers<[1], [0], [0], [1], [0, 0, 1, 1], [], []>} : vector<4x4xbf16>, vector<4x512xbf16>, vector<4x512xf32> -> vector<4x512xf32>
    %118 = arith.addf %91, %117 : vector<4x512xf32>
    %c4 = arith.constant 4 : index
    %c0_52 = arith.constant 0 : index
    %c0_53 = arith.constant 0 : index
    %119 = vector.load %arg1[%c4, %c0_52, %c0_53] : memref<9x4x4xbf16, #tpu.memory_space<vmem>>, vector<1x4x4xbf16>
    %120 = vector.shape_cast %119 : vector<1x4x4xbf16> to vector<4x4xbf16>
    %121 = arith.truncf %11 : vector<4x512xf32> to vector<4x512xbf16>
    %cst_54 = arith.constant dense<0.000000e+00> : vector<4x512xf32>
    %122 = tpu.matmul %120, %121, %cst_54 {dimension_numbers = #tpu.dot_dimension_numbers<[1], [0], [0], [1], [0, 0, 1, 1], [], []>} : vector<4x4xbf16>, vector<4x512xbf16>, vector<4x512xf32> -> vector<4x512xf32>
    %123 = arith.addf %118, %122 : vector<4x512xf32>
    %c511_i32 = arith.constant 511 : i32
    %124 = tpu.dynamic_rotate %11 by %c511_i32 dim 1 : vector<4x512xf32>, i32 -> vector<4x512xf32>
    %c0_i32_55 = arith.constant 0 : i32
    %125 = vector.broadcast %c0_i32_55 : i32 to vector<4x512xi32>
    %126 = arith.addi %6, %125 : vector<4x512xi32>
    %c0_i32_56 = arith.constant 0 : i32
    %127 = vector.broadcast %c0_i32_56 : i32 to vector<4x512xi32>
    %128 = arith.cmpi sge, %126, %127 : vector<4x512xi32>
    %c0_i32_57 = arith.constant 0 : i32
    %129 = vector.broadcast %c0_i32_57 : i32 to vector<4x512xi32>
    %130 = arith.addi %6, %129 : vector<4x512xi32>
    %c16_i32_58 = arith.constant 16 : i32
    %131 = vector.broadcast %c16_i32_58 : i32 to vector<4x512xi32>
    %132 = arith.cmpi slt, %130, %131 : vector<4x512xi32>
    %133 = arith.andi %128, %132 : vector<4x512xi1>
    %c1_i32_59 = arith.constant 1 : i32
    %134 = vector.broadcast %c1_i32_59 : i32 to vector<4x512xi32>
    %135 = arith.addi %2, %134 : vector<4x512xi32>
    %c0_i32_60 = arith.constant 0 : i32
    %136 = vector.broadcast %c0_i32_60 : i32 to vector<4x512xi32>
    %137 = arith.cmpi sge, %135, %136 : vector<4x512xi32>
    %138 = arith.andi %133, %137 : vector<4x512xi1>
    %c1_i32_61 = arith.constant 1 : i32
    %139 = vector.broadcast %c1_i32_61 : i32 to vector<4x512xi32>
    %140 = arith.addi %2, %139 : vector<4x512xi32>
    %c16_i32_62 = arith.constant 16 : i32
    %141 = vector.broadcast %c16_i32_62 : i32 to vector<4x512xi32>
    %142 = arith.cmpi slt, %140, %141 : vector<4x512xi32>
    %143 = arith.andi %138, %142 : vector<4x512xi1>
    %cst_63 = arith.constant 0.000000e+00 : f32
    %144 = vector.broadcast %cst_63 : f32 to vector<4x512xf32>
    %145 = arith.select %143, %124, %144 : vector<4x512xi1>, vector<4x512xf32>
    %c5 = arith.constant 5 : index
    %c0_64 = arith.constant 0 : index
    %c0_65 = arith.constant 0 : index
    %146 = vector.load %arg1[%c5, %c0_64, %c0_65] : memref<9x4x4xbf16, #tpu.memory_space<vmem>>, vector<1x4x4xbf16>
    %147 = vector.shape_cast %146 : vector<1x4x4xbf16> to vector<4x4xbf16>
    %148 = arith.truncf %145 : vector<4x512xf32> to vector<4x512xbf16>
    %cst_66 = arith.constant dense<0.000000e+00> : vector<4x512xf32>
    %149 = tpu.matmul %147, %148, %cst_66 {dimension_numbers = #tpu.dot_dimension_numbers<[1], [0], [0], [1], [0, 0, 1, 1], [], []>} : vector<4x4xbf16>, vector<4x512xbf16>, vector<4x512xf32> -> vector<4x512xf32>
    %150 = arith.addf %123, %149 : vector<4x512xf32>
    %c497_i32 = arith.constant 497 : i32
    %151 = tpu.dynamic_rotate %11 by %c497_i32 dim 1 : vector<4x512xf32>, i32 -> vector<4x512xf32>
    %c1_i32_67 = arith.constant 1 : i32
    %152 = vector.broadcast %c1_i32_67 : i32 to vector<4x512xi32>
    %153 = arith.addi %6, %152 : vector<4x512xi32>
    %c0_i32_68 = arith.constant 0 : i32
    %154 = vector.broadcast %c0_i32_68 : i32 to vector<4x512xi32>
    %155 = arith.cmpi sge, %153, %154 : vector<4x512xi32>
    %c1_i32_69 = arith.constant 1 : i32
    %156 = vector.broadcast %c1_i32_69 : i32 to vector<4x512xi32>
    %157 = arith.addi %6, %156 : vector<4x512xi32>
    %c16_i32_70 = arith.constant 16 : i32
    %158 = vector.broadcast %c16_i32_70 : i32 to vector<4x512xi32>
    %159 = arith.cmpi slt, %157, %158 : vector<4x512xi32>
    %160 = arith.andi %155, %159 : vector<4x512xi1>
    %c-1_i32_71 = arith.constant -1 : i32
    %161 = vector.broadcast %c-1_i32_71 : i32 to vector<4x512xi32>
    %162 = arith.addi %2, %161 : vector<4x512xi32>
    %c0_i32_72 = arith.constant 0 : i32
    %163 = vector.broadcast %c0_i32_72 : i32 to vector<4x512xi32>
    %164 = arith.cmpi sge, %162, %163 : vector<4x512xi32>
    %165 = arith.andi %160, %164 : vector<4x512xi1>
    %c-1_i32_73 = arith.constant -1 : i32
    %166 = vector.broadcast %c-1_i32_73 : i32 to vector<4x512xi32>
    %167 = arith.addi %2, %166 : vector<4x512xi32>
    %c16_i32_74 = arith.constant 16 : i32
    %168 = vector.broadcast %c16_i32_74 : i32 to vector<4x512xi32>
    %169 = arith.cmpi slt, %167, %168 : vector<4x512xi32>
    %170 = arith.andi %165, %169 : vector<4x512xi1>
    %cst_75 = arith.constant 0.000000e+00 : f32
    %171 = vector.broadcast %cst_75 : f32 to vector<4x512xf32>
    %172 = arith.select %170, %151, %171 : vector<4x512xi1>, vector<4x512xf32>
    %c6 = arith.constant 6 : index
    %c0_76 = arith.constant 0 : index
    %c0_77 = arith.constant 0 : index
    %173 = vector.load %arg1[%c6, %c0_76, %c0_77] : memref<9x4x4xbf16, #tpu.memory_space<vmem>>, vector<1x4x4xbf16>
    %174 = vector.shape_cast %173 : vector<1x4x4xbf16> to vector<4x4xbf16>
    %175 = arith.truncf %172 : vector<4x512xf32> to vector<4x512xbf16>
    %cst_78 = arith.constant dense<0.000000e+00> : vector<4x512xf32>
    %176 = tpu.matmul %174, %175, %cst_78 {dimension_numbers = #tpu.dot_dimension_numbers<[1], [0], [0], [1], [0, 0, 1, 1], [], []>} : vector<4x4xbf16>, vector<4x512xbf16>, vector<4x512xf32> -> vector<4x512xf32>
    %177 = arith.addf %150, %176 : vector<4x512xf32>
    %c496_i32 = arith.constant 496 : i32
    %178 = tpu.dynamic_rotate %11 by %c496_i32 dim 1 : vector<4x512xf32>, i32 -> vector<4x512xf32>
    %c1_i32_79 = arith.constant 1 : i32
    %179 = vector.broadcast %c1_i32_79 : i32 to vector<4x512xi32>
    %180 = arith.addi %6, %179 : vector<4x512xi32>
    %c0_i32_80 = arith.constant 0 : i32
    %181 = vector.broadcast %c0_i32_80 : i32 to vector<4x512xi32>
    %182 = arith.cmpi sge, %180, %181 : vector<4x512xi32>
    %c1_i32_81 = arith.constant 1 : i32
    %183 = vector.broadcast %c1_i32_81 : i32 to vector<4x512xi32>
    %184 = arith.addi %6, %183 : vector<4x512xi32>
    %c16_i32_82 = arith.constant 16 : i32
    %185 = vector.broadcast %c16_i32_82 : i32 to vector<4x512xi32>
    %186 = arith.cmpi slt, %184, %185 : vector<4x512xi32>
    %187 = arith.andi %182, %186 : vector<4x512xi1>
    %c0_i32_83 = arith.constant 0 : i32
    %188 = vector.broadcast %c0_i32_83 : i32 to vector<4x512xi32>
    %189 = arith.addi %2, %188 : vector<4x512xi32>
    %c0_i32_84 = arith.constant 0 : i32
    %190 = vector.broadcast %c0_i32_84 : i32 to vector<4x512xi32>
    %191 = arith.cmpi sge, %189, %190 : vector<4x512xi32>
    %192 = arith.andi %187, %191 : vector<4x512xi1>
    %c0_i32_85 = arith.constant 0 : i32
    %193 = vector.broadcast %c0_i32_85 : i32 to vector<4x512xi32>
    %194 = arith.addi %2, %193 : vector<4x512xi32>
    %c16_i32_86 = arith.constant 16 : i32
    %195 = vector.broadcast %c16_i32_86 : i32 to vector<4x512xi32>
    %196 = arith.cmpi slt, %194, %195 : vector<4x512xi32>
    %197 = arith.andi %192, %196 : vector<4x512xi1>
    %cst_87 = arith.constant 0.000000e+00 : f32
    %198 = vector.broadcast %cst_87 : f32 to vector<4x512xf32>
    %199 = arith.select %197, %178, %198 : vector<4x512xi1>, vector<4x512xf32>
    %c7 = arith.constant 7 : index
    %c0_88 = arith.constant 0 : index
    %c0_89 = arith.constant 0 : index
    %200 = vector.load %arg1[%c7, %c0_88, %c0_89] : memref<9x4x4xbf16, #tpu.memory_space<vmem>>, vector<1x4x4xbf16>
    %201 = vector.shape_cast %200 : vector<1x4x4xbf16> to vector<4x4xbf16>
    %202 = arith.truncf %199 : vector<4x512xf32> to vector<4x512xbf16>
    %cst_90 = arith.constant dense<0.000000e+00> : vector<4x512xf32>
    %203 = tpu.matmul %201, %202, %cst_90 {dimension_numbers = #tpu.dot_dimension_numbers<[1], [0], [0], [1], [0, 0, 1, 1], [], []>} : vector<4x4xbf16>, vector<4x512xbf16>, vector<4x512xf32> -> vector<4x512xf32>
    %204 = arith.addf %177, %203 : vector<4x512xf32>
    %c495_i32 = arith.constant 495 : i32
    %205 = tpu.dynamic_rotate %11 by %c495_i32 dim 1 : vector<4x512xf32>, i32 -> vector<4x512xf32>
    %c1_i32_91 = arith.constant 1 : i32
    %206 = vector.broadcast %c1_i32_91 : i32 to vector<4x512xi32>
    %207 = arith.addi %6, %206 : vector<4x512xi32>
    %c0_i32_92 = arith.constant 0 : i32
    %208 = vector.broadcast %c0_i32_92 : i32 to vector<4x512xi32>
    %209 = arith.cmpi sge, %207, %208 : vector<4x512xi32>
    %c1_i32_93 = arith.constant 1 : i32
    %210 = vector.broadcast %c1_i32_93 : i32 to vector<4x512xi32>
    %211 = arith.addi %6, %210 : vector<4x512xi32>
    %c16_i32_94 = arith.constant 16 : i32
    %212 = vector.broadcast %c16_i32_94 : i32 to vector<4x512xi32>
    %213 = arith.cmpi slt, %211, %212 : vector<4x512xi32>
    %214 = arith.andi %209, %213 : vector<4x512xi1>
    %c1_i32_95 = arith.constant 1 : i32
    %215 = vector.broadcast %c1_i32_95 : i32 to vector<4x512xi32>
    %216 = arith.addi %2, %215 : vector<4x512xi32>
    %c0_i32_96 = arith.constant 0 : i32
    %217 = vector.broadcast %c0_i32_96 : i32 to vector<4x512xi32>
    %218 = arith.cmpi sge, %216, %217 : vector<4x512xi32>
    %219 = arith.andi %214, %218 : vector<4x512xi1>
    %c1_i32_97 = arith.constant 1 : i32
    %220 = vector.broadcast %c1_i32_97 : i32 to vector<4x512xi32>
    %221 = arith.addi %2, %220 : vector<4x512xi32>
    %c16_i32_98 = arith.constant 16 : i32
    %222 = vector.broadcast %c16_i32_98 : i32 to vector<4x512xi32>
    %223 = arith.cmpi slt, %221, %222 : vector<4x512xi32>
    %224 = arith.andi %219, %223 : vector<4x512xi1>
    %cst_99 = arith.constant 0.000000e+00 : f32
    %225 = vector.broadcast %cst_99 : f32 to vector<4x512xf32>
    %226 = arith.select %224, %205, %225 : vector<4x512xi1>, vector<4x512xf32>
    %c8 = arith.constant 8 : index
    %c0_100 = arith.constant 0 : index
    %c0_101 = arith.constant 0 : index
    %227 = vector.load %arg1[%c8, %c0_100, %c0_101] : memref<9x4x4xbf16, #tpu.memory_space<vmem>>, vector<1x4x4xbf16>
    %228 = vector.shape_cast %227 : vector<1x4x4xbf16> to vector<4x4xbf16>
    %229 = arith.truncf %226 : vector<4x512xf32> to vector<4x512xbf16>
    %cst_102 = arith.constant dense<0.000000e+00> : vector<4x512xf32>
    %230 = tpu.matmul %228, %229, %cst_102 {dimension_numbers = #tpu.dot_dimension_numbers<[1], [0], [0], [1], [0, 0, 1, 1], [], []>} : vector<4x4xbf16>, vector<4x512xbf16>, vector<4x512xf32> -> vector<4x512xf32>
    %231 = arith.addf %204, %230 : vector<4x512xf32>
    %cst_103 = arith.constant dense<0.000000e+00> : vector<4xf32>
    %232 = vector.multi_reduction <add>, %231, %cst_103 [1] : vector<4x512xf32> to vector<4xf32>
    %233 = vector.shape_cast %232 : vector<4xf32> to vector<4x1xf32>
    %cst_104 = arith.constant 0.001953125 : f32
    %234 = vector.broadcast %cst_104 : f32 to vector<4x1xf32>
    %235 = arith.mulf %233, %234 : vector<4x1xf32>
    %236 = arith.mulf %231, %231 : vector<4x512xf32>
    %cst_105 = arith.constant dense<0.000000e+00> : vector<4xf32>
    %237 = vector.multi_reduction <add>, %236, %cst_105 [1] : vector<4x512xf32> to vector<4xf32>
    %238 = vector.shape_cast %237 : vector<4xf32> to vector<4x1xf32>
    %cst_106 = arith.constant 0.001953125 : f32
    %239 = vector.broadcast %cst_106 : f32 to vector<4x1xf32>
    %240 = arith.mulf %238, %239 : vector<4x1xf32>
    %241 = arith.mulf %235, %235 : vector<4x1xf32>
    %242 = arith.subf %240, %241 : vector<4x1xf32>
    %c0_107 = arith.constant 0 : index
    %c0_108 = arith.constant 0 : index
    %243 = vector.load %arg2[%c0_107, %c0_108] : memref<4x1xf32, #tpu.memory_space<vmem>>, vector<4x1xf32>
    %cst_109 = arith.constant 9.99999974E-6 : f32
    %244 = vector.broadcast %cst_109 : f32 to vector<4x1xf32>
    %245 = arith.addf %242, %244 : vector<4x1xf32>
    %246 = math.rsqrt %245 : vector<4x1xf32>
    %247 = arith.mulf %243, %246 : vector<4x1xf32>
    %248 = vector.broadcast %247 : vector<4x1xf32> to vector<4x512xf32>
    %249 = arith.mulf %231, %248 : vector<4x512xf32>
    %c0_110 = arith.constant 0 : index
    %c0_111 = arith.constant 0 : index
    %250 = vector.load %arg3[%c0_110, %c0_111] : memref<4x1xf32, #tpu.memory_space<vmem>>, vector<4x1xf32>
    %251 = arith.mulf %235, %247 : vector<4x1xf32>
    %252 = arith.subf %250, %251 : vector<4x1xf32>
    %253 = vector.broadcast %252 : vector<4x1xf32> to vector<4x512xf32>
    %254 = arith.addf %249, %253 : vector<4x512xf32>
    %cst_112 = arith.constant 0.000000e+00 : f32
    %255 = vector.broadcast %cst_112 : f32 to vector<4x512xf32>
    %256 = arith.maximumf %254, %255 : vector<4x512xf32>
    %c17_i32_113 = arith.constant 17 : i32
    %257 = tpu.dynamic_rotate %256 by %c17_i32_113 dim 1 : vector<4x512xf32>, i32 -> vector<4x512xf32>
    %c-1_i32_114 = arith.constant -1 : i32
    %258 = vector.broadcast %c-1_i32_114 : i32 to vector<4x512xi32>
    %259 = arith.addi %6, %258 : vector<4x512xi32>
    %c0_i32_115 = arith.constant 0 : i32
    %260 = vector.broadcast %c0_i32_115 : i32 to vector<4x512xi32>
    %261 = arith.cmpi sge, %259, %260 : vector<4x512xi32>
    %c-1_i32_116 = arith.constant -1 : i32
    %262 = vector.broadcast %c-1_i32_116 : i32 to vector<4x512xi32>
    %263 = arith.addi %6, %262 : vector<4x512xi32>
    %c16_i32_117 = arith.constant 16 : i32
    %264 = vector.broadcast %c16_i32_117 : i32 to vector<4x512xi32>
    %265 = arith.cmpi slt, %263, %264 : vector<4x512xi32>
    %266 = arith.andi %261, %265 : vector<4x512xi1>
    %c-1_i32_118 = arith.constant -1 : i32
    %267 = vector.broadcast %c-1_i32_118 : i32 to vector<4x512xi32>
    %268 = arith.addi %2, %267 : vector<4x512xi32>
    %c0_i32_119 = arith.constant 0 : i32
    %269 = vector.broadcast %c0_i32_119 : i32 to vector<4x512xi32>
    %270 = arith.cmpi sge, %268, %269 : vector<4x512xi32>
    %271 = arith.andi %266, %270 : vector<4x512xi1>
    %c-1_i32_120 = arith.constant -1 : i32
    %272 = vector.broadcast %c-1_i32_120 : i32 to vector<4x512xi32>
    %273 = arith.addi %2, %272 : vector<4x512xi32>
    %c16_i32_121 = arith.constant 16 : i32
    %274 = vector.broadcast %c16_i32_121 : i32 to vector<4x512xi32>
    %275 = arith.cmpi slt, %273, %274 : vector<4x512xi32>
    %276 = arith.andi %271, %275 : vector<4x512xi1>
    %cst_122 = arith.constant 0.000000e+00 : f32
    %277 = vector.broadcast %cst_122 : f32 to vector<4x512xf32>
    %278 = arith.select %276, %257, %277 : vector<4x512xi1>, vector<4x512xf32>
    %c0_123 = arith.constant 0 : index
    %c0_124 = arith.constant 0 : index
    %c0_125 = arith.constant 0 : index
    %279 = vector.load %arg4[%c0_123, %c0_124, %c0_125] : memref<9x4x4xbf16, #tpu.memory_space<vmem>>, vector<1x4x4xbf16>
    %280 = vector.shape_cast %279 : vector<1x4x4xbf16> to vector<4x4xbf16>
    %281 = arith.truncf %278 : vector<4x512xf32> to vector<4x512xbf16>
    %cst_126 = arith.constant dense<0.000000e+00> : vector<4x512xf32>
    %282 = tpu.matmul %280, %281, %cst_126 {dimension_numbers = #tpu.dot_dimension_numbers<[1], [0], [0], [1], [0, 0, 1, 1], [], []>} : vector<4x4xbf16>, vector<4x512xbf16>, vector<4x512xf32> -> vector<4x512xf32>
    %c16_i32_127 = arith.constant 16 : i32
    %283 = tpu.dynamic_rotate %256 by %c16_i32_127 dim 1 : vector<4x512xf32>, i32 -> vector<4x512xf32>
    %c-1_i32_128 = arith.constant -1 : i32
    %284 = vector.broadcast %c-1_i32_128 : i32 to vector<4x512xi32>
    %285 = arith.addi %6, %284 : vector<4x512xi32>
    %c0_i32_129 = arith.constant 0 : i32
    %286 = vector.broadcast %c0_i32_129 : i32 to vector<4x512xi32>
    %287 = arith.cmpi sge, %285, %286 : vector<4x512xi32>
    %c-1_i32_130 = arith.constant -1 : i32
    %288 = vector.broadcast %c-1_i32_130 : i32 to vector<4x512xi32>
    %289 = arith.addi %6, %288 : vector<4x512xi32>
    %c16_i32_131 = arith.constant 16 : i32
    %290 = vector.broadcast %c16_i32_131 : i32 to vector<4x512xi32>
    %291 = arith.cmpi slt, %289, %290 : vector<4x512xi32>
    %292 = arith.andi %287, %291 : vector<4x512xi1>
    %c0_i32_132 = arith.constant 0 : i32
    %293 = vector.broadcast %c0_i32_132 : i32 to vector<4x512xi32>
    %294 = arith.addi %2, %293 : vector<4x512xi32>
    %c0_i32_133 = arith.constant 0 : i32
    %295 = vector.broadcast %c0_i32_133 : i32 to vector<4x512xi32>
    %296 = arith.cmpi sge, %294, %295 : vector<4x512xi32>
    %297 = arith.andi %292, %296 : vector<4x512xi1>
    %c0_i32_134 = arith.constant 0 : i32
    %298 = vector.broadcast %c0_i32_134 : i32 to vector<4x512xi32>
    %299 = arith.addi %2, %298 : vector<4x512xi32>
    %c16_i32_135 = arith.constant 16 : i32
    %300 = vector.broadcast %c16_i32_135 : i32 to vector<4x512xi32>
    %301 = arith.cmpi slt, %299, %300 : vector<4x512xi32>
    %302 = arith.andi %297, %301 : vector<4x512xi1>
    %cst_136 = arith.constant 0.000000e+00 : f32
    %303 = vector.broadcast %cst_136 : f32 to vector<4x512xf32>
    %304 = arith.select %302, %283, %303 : vector<4x512xi1>, vector<4x512xf32>
    %c1_137 = arith.constant 1 : index
    %c0_138 = arith.constant 0 : index
    %c0_139 = arith.constant 0 : index
    %305 = vector.load %arg4[%c1_137, %c0_138, %c0_139] : memref<9x4x4xbf16, #tpu.memory_space<vmem>>, vector<1x4x4xbf16>
    %306 = vector.shape_cast %305 : vector<1x4x4xbf16> to vector<4x4xbf16>
    %307 = arith.truncf %304 : vector<4x512xf32> to vector<4x512xbf16>
    %cst_140 = arith.constant dense<0.000000e+00> : vector<4x512xf32>
    %308 = tpu.matmul %306, %307, %cst_140 {dimension_numbers = #tpu.dot_dimension_numbers<[1], [0], [0], [1], [0, 0, 1, 1], [], []>} : vector<4x4xbf16>, vector<4x512xbf16>, vector<4x512xf32> -> vector<4x512xf32>
    %309 = arith.addf %282, %308 : vector<4x512xf32>
    %c15_i32_141 = arith.constant 15 : i32
    %310 = tpu.dynamic_rotate %256 by %c15_i32_141 dim 1 : vector<4x512xf32>, i32 -> vector<4x512xf32>
    %c-1_i32_142 = arith.constant -1 : i32
    %311 = vector.broadcast %c-1_i32_142 : i32 to vector<4x512xi32>
    %312 = arith.addi %6, %311 : vector<4x512xi32>
    %c0_i32_143 = arith.constant 0 : i32
    %313 = vector.broadcast %c0_i32_143 : i32 to vector<4x512xi32>
    %314 = arith.cmpi sge, %312, %313 : vector<4x512xi32>
    %c-1_i32_144 = arith.constant -1 : i32
    %315 = vector.broadcast %c-1_i32_144 : i32 to vector<4x512xi32>
    %316 = arith.addi %6, %315 : vector<4x512xi32>
    %c16_i32_145 = arith.constant 16 : i32
    %317 = vector.broadcast %c16_i32_145 : i32 to vector<4x512xi32>
    %318 = arith.cmpi slt, %316, %317 : vector<4x512xi32>
    %319 = arith.andi %314, %318 : vector<4x512xi1>
    %c1_i32_146 = arith.constant 1 : i32
    %320 = vector.broadcast %c1_i32_146 : i32 to vector<4x512xi32>
    %321 = arith.addi %2, %320 : vector<4x512xi32>
    %c0_i32_147 = arith.constant 0 : i32
    %322 = vector.broadcast %c0_i32_147 : i32 to vector<4x512xi32>
    %323 = arith.cmpi sge, %321, %322 : vector<4x512xi32>
    %324 = arith.andi %319, %323 : vector<4x512xi1>
    %c1_i32_148 = arith.constant 1 : i32
    %325 = vector.broadcast %c1_i32_148 : i32 to vector<4x512xi32>
    %326 = arith.addi %2, %325 : vector<4x512xi32>
    %c16_i32_149 = arith.constant 16 : i32
    %327 = vector.broadcast %c16_i32_149 : i32 to vector<4x512xi32>
    %328 = arith.cmpi slt, %326, %327 : vector<4x512xi32>
    %329 = arith.andi %324, %328 : vector<4x512xi1>
    %cst_150 = arith.constant 0.000000e+00 : f32
    %330 = vector.broadcast %cst_150 : f32 to vector<4x512xf32>
    %331 = arith.select %329, %310, %330 : vector<4x512xi1>, vector<4x512xf32>
    %c2_151 = arith.constant 2 : index
    %c0_152 = arith.constant 0 : index
    %c0_153 = arith.constant 0 : index
    %332 = vector.load %arg4[%c2_151, %c0_152, %c0_153] : memref<9x4x4xbf16, #tpu.memory_space<vmem>>, vector<1x4x4xbf16>
    %333 = vector.shape_cast %332 : vector<1x4x4xbf16> to vector<4x4xbf16>
    %334 = arith.truncf %331 : vector<4x512xf32> to vector<4x512xbf16>
    %cst_154 = arith.constant dense<0.000000e+00> : vector<4x512xf32>
    %335 = tpu.matmul %333, %334, %cst_154 {dimension_numbers = #tpu.dot_dimension_numbers<[1], [0], [0], [1], [0, 0, 1, 1], [], []>} : vector<4x4xbf16>, vector<4x512xbf16>, vector<4x512xf32> -> vector<4x512xf32>
    %336 = arith.addf %309, %335 : vector<4x512xf32>
    %c1_i32_155 = arith.constant 1 : i32
    %337 = tpu.dynamic_rotate %256 by %c1_i32_155 dim 1 : vector<4x512xf32>, i32 -> vector<4x512xf32>
    %c0_i32_156 = arith.constant 0 : i32
    %338 = vector.broadcast %c0_i32_156 : i32 to vector<4x512xi32>
    %339 = arith.addi %6, %338 : vector<4x512xi32>
    %c0_i32_157 = arith.constant 0 : i32
    %340 = vector.broadcast %c0_i32_157 : i32 to vector<4x512xi32>
    %341 = arith.cmpi sge, %339, %340 : vector<4x512xi32>
    %c0_i32_158 = arith.constant 0 : i32
    %342 = vector.broadcast %c0_i32_158 : i32 to vector<4x512xi32>
    %343 = arith.addi %6, %342 : vector<4x512xi32>
    %c16_i32_159 = arith.constant 16 : i32
    %344 = vector.broadcast %c16_i32_159 : i32 to vector<4x512xi32>
    %345 = arith.cmpi slt, %343, %344 : vector<4x512xi32>
    %346 = arith.andi %341, %345 : vector<4x512xi1>
    %c-1_i32_160 = arith.constant -1 : i32
    %347 = vector.broadcast %c-1_i32_160 : i32 to vector<4x512xi32>
    %348 = arith.addi %2, %347 : vector<4x512xi32>
    %c0_i32_161 = arith.constant 0 : i32
    %349 = vector.broadcast %c0_i32_161 : i32 to vector<4x512xi32>
    %350 = arith.cmpi sge, %348, %349 : vector<4x512xi32>
    %351 = arith.andi %346, %350 : vector<4x512xi1>
    %c-1_i32_162 = arith.constant -1 : i32
    %352 = vector.broadcast %c-1_i32_162 : i32 to vector<4x512xi32>
    %353 = arith.addi %2, %352 : vector<4x512xi32>
    %c16_i32_163 = arith.constant 16 : i32
    %354 = vector.broadcast %c16_i32_163 : i32 to vector<4x512xi32>
    %355 = arith.cmpi slt, %353, %354 : vector<4x512xi32>
    %356 = arith.andi %351, %355 : vector<4x512xi1>
    %cst_164 = arith.constant 0.000000e+00 : f32
    %357 = vector.broadcast %cst_164 : f32 to vector<4x512xf32>
    %358 = arith.select %356, %337, %357 : vector<4x512xi1>, vector<4x512xf32>
    %c3_165 = arith.constant 3 : index
    %c0_166 = arith.constant 0 : index
    %c0_167 = arith.constant 0 : index
    %359 = vector.load %arg4[%c3_165, %c0_166, %c0_167] : memref<9x4x4xbf16, #tpu.memory_space<vmem>>, vector<1x4x4xbf16>
    %360 = vector.shape_cast %359 : vector<1x4x4xbf16> to vector<4x4xbf16>
    %361 = arith.truncf %358 : vector<4x512xf32> to vector<4x512xbf16>
    %cst_168 = arith.constant dense<0.000000e+00> : vector<4x512xf32>
    %362 = tpu.matmul %360, %361, %cst_168 {dimension_numbers = #tpu.dot_dimension_numbers<[1], [0], [0], [1], [0, 0, 1, 1], [], []>} : vector<4x4xbf16>, vector<4x512xbf16>, vector<4x512xf32> -> vector<4x512xf32>
    %363 = arith.addf %336, %362 : vector<4x512xf32>
    %c4_169 = arith.constant 4 : index
    %c0_170 = arith.constant 0 : index
    %c0_171 = arith.constant 0 : index
    %364 = vector.load %arg4[%c4_169, %c0_170, %c0_171] : memref<9x4x4xbf16, #tpu.memory_space<vmem>>, vector<1x4x4xbf16>
    %365 = vector.shape_cast %364 : vector<1x4x4xbf16> to vector<4x4xbf16>
    %366 = arith.truncf %256 : vector<4x512xf32> to vector<4x512xbf16>
    %cst_172 = arith.constant dense<0.000000e+00> : vector<4x512xf32>
    %367 = tpu.matmul %365, %366, %cst_172 {dimension_numbers = #tpu.dot_dimension_numbers<[1], [0], [0], [1], [0, 0, 1, 1], [], []>} : vector<4x4xbf16>, vector<4x512xbf16>, vector<4x512xf32> -> vector<4x512xf32>
    %368 = arith.addf %363, %367 : vector<4x512xf32>
    %c511_i32_173 = arith.constant 511 : i32
    %369 = tpu.dynamic_rotate %256 by %c511_i32_173 dim 1 : vector<4x512xf32>, i32 -> vector<4x512xf32>
    %c0_i32_174 = arith.constant 0 : i32
    %370 = vector.broadcast %c0_i32_174 : i32 to vector<4x512xi32>
    %371 = arith.addi %6, %370 : vector<4x512xi32>
    %c0_i32_175 = arith.constant 0 : i32
    %372 = vector.broadcast %c0_i32_175 : i32 to vector<4x512xi32>
    %373 = arith.cmpi sge, %371, %372 : vector<4x512xi32>
    %c0_i32_176 = arith.constant 0 : i32
    %374 = vector.broadcast %c0_i32_176 : i32 to vector<4x512xi32>
    %375 = arith.addi %6, %374 : vector<4x512xi32>
    %c16_i32_177 = arith.constant 16 : i32
    %376 = vector.broadcast %c16_i32_177 : i32 to vector<4x512xi32>
    %377 = arith.cmpi slt, %375, %376 : vector<4x512xi32>
    %378 = arith.andi %373, %377 : vector<4x512xi1>
    %c1_i32_178 = arith.constant 1 : i32
    %379 = vector.broadcast %c1_i32_178 : i32 to vector<4x512xi32>
    %380 = arith.addi %2, %379 : vector<4x512xi32>
    %c0_i32_179 = arith.constant 0 : i32
    %381 = vector.broadcast %c0_i32_179 : i32 to vector<4x512xi32>
    %382 = arith.cmpi sge, %380, %381 : vector<4x512xi32>
    %383 = arith.andi %378, %382 : vector<4x512xi1>
    %c1_i32_180 = arith.constant 1 : i32
    %384 = vector.broadcast %c1_i32_180 : i32 to vector<4x512xi32>
    %385 = arith.addi %2, %384 : vector<4x512xi32>
    %c16_i32_181 = arith.constant 16 : i32
    %386 = vector.broadcast %c16_i32_181 : i32 to vector<4x512xi32>
    %387 = arith.cmpi slt, %385, %386 : vector<4x512xi32>
    %388 = arith.andi %383, %387 : vector<4x512xi1>
    %cst_182 = arith.constant 0.000000e+00 : f32
    %389 = vector.broadcast %cst_182 : f32 to vector<4x512xf32>
    %390 = arith.select %388, %369, %389 : vector<4x512xi1>, vector<4x512xf32>
    %c5_183 = arith.constant 5 : index
    %c0_184 = arith.constant 0 : index
    %c0_185 = arith.constant 0 : index
    %391 = vector.load %arg4[%c5_183, %c0_184, %c0_185] : memref<9x4x4xbf16, #tpu.memory_space<vmem>>, vector<1x4x4xbf16>
    %392 = vector.shape_cast %391 : vector<1x4x4xbf16> to vector<4x4xbf16>
    %393 = arith.truncf %390 : vector<4x512xf32> to vector<4x512xbf16>
    %cst_186 = arith.constant dense<0.000000e+00> : vector<4x512xf32>
    %394 = tpu.matmul %392, %393, %cst_186 {dimension_numbers = #tpu.dot_dimension_numbers<[1], [0], [0], [1], [0, 0, 1, 1], [], []>} : vector<4x4xbf16>, vector<4x512xbf16>, vector<4x512xf32> -> vector<4x512xf32>
    %395 = arith.addf %368, %394 : vector<4x512xf32>
    %c497_i32_187 = arith.constant 497 : i32
    %396 = tpu.dynamic_rotate %256 by %c497_i32_187 dim 1 : vector<4x512xf32>, i32 -> vector<4x512xf32>
    %c1_i32_188 = arith.constant 1 : i32
    %397 = vector.broadcast %c1_i32_188 : i32 to vector<4x512xi32>
    %398 = arith.addi %6, %397 : vector<4x512xi32>
    %c0_i32_189 = arith.constant 0 : i32
    %399 = vector.broadcast %c0_i32_189 : i32 to vector<4x512xi32>
    %400 = arith.cmpi sge, %398, %399 : vector<4x512xi32>
    %c1_i32_190 = arith.constant 1 : i32
    %401 = vector.broadcast %c1_i32_190 : i32 to vector<4x512xi32>
    %402 = arith.addi %6, %401 : vector<4x512xi32>
    %c16_i32_191 = arith.constant 16 : i32
    %403 = vector.broadcast %c16_i32_191 : i32 to vector<4x512xi32>
    %404 = arith.cmpi slt, %402, %403 : vector<4x512xi32>
    %405 = arith.andi %400, %404 : vector<4x512xi1>
    %c-1_i32_192 = arith.constant -1 : i32
    %406 = vector.broadcast %c-1_i32_192 : i32 to vector<4x512xi32>
    %407 = arith.addi %2, %406 : vector<4x512xi32>
    %c0_i32_193 = arith.constant 0 : i32
    %408 = vector.broadcast %c0_i32_193 : i32 to vector<4x512xi32>
    %409 = arith.cmpi sge, %407, %408 : vector<4x512xi32>
    %410 = arith.andi %405, %409 : vector<4x512xi1>
    %c-1_i32_194 = arith.constant -1 : i32
    %411 = vector.broadcast %c-1_i32_194 : i32 to vector<4x512xi32>
    %412 = arith.addi %2, %411 : vector<4x512xi32>
    %c16_i32_195 = arith.constant 16 : i32
    %413 = vector.broadcast %c16_i32_195 : i32 to vector<4x512xi32>
    %414 = arith.cmpi slt, %412, %413 : vector<4x512xi32>
    %415 = arith.andi %410, %414 : vector<4x512xi1>
    %cst_196 = arith.constant 0.000000e+00 : f32
    %416 = vector.broadcast %cst_196 : f32 to vector<4x512xf32>
    %417 = arith.select %415, %396, %416 : vector<4x512xi1>, vector<4x512xf32>
    %c6_197 = arith.constant 6 : index
    %c0_198 = arith.constant 0 : index
    %c0_199 = arith.constant 0 : index
    %418 = vector.load %arg4[%c6_197, %c0_198, %c0_199] : memref<9x4x4xbf16, #tpu.memory_space<vmem>>, vector<1x4x4xbf16>
    %419 = vector.shape_cast %418 : vector<1x4x4xbf16> to vector<4x4xbf16>
    %420 = arith.truncf %417 : vector<4x512xf32> to vector<4x512xbf16>
    %cst_200 = arith.constant dense<0.000000e+00> : vector<4x512xf32>
    %421 = tpu.matmul %419, %420, %cst_200 {dimension_numbers = #tpu.dot_dimension_numbers<[1], [0], [0], [1], [0, 0, 1, 1], [], []>} : vector<4x4xbf16>, vector<4x512xbf16>, vector<4x512xf32> -> vector<4x512xf32>
    %422 = arith.addf %395, %421 : vector<4x512xf32>
    %c496_i32_201 = arith.constant 496 : i32
    %423 = tpu.dynamic_rotate %256 by %c496_i32_201 dim 1 : vector<4x512xf32>, i32 -> vector<4x512xf32>
    %c1_i32_202 = arith.constant 1 : i32
    %424 = vector.broadcast %c1_i32_202 : i32 to vector<4x512xi32>
    %425 = arith.addi %6, %424 : vector<4x512xi32>
    %c0_i32_203 = arith.constant 0 : i32
    %426 = vector.broadcast %c0_i32_203 : i32 to vector<4x512xi32>
    %427 = arith.cmpi sge, %425, %426 : vector<4x512xi32>
    %c1_i32_204 = arith.constant 1 : i32
    %428 = vector.broadcast %c1_i32_204 : i32 to vector<4x512xi32>
    %429 = arith.addi %6, %428 : vector<4x512xi32>
    %c16_i32_205 = arith.constant 16 : i32
    %430 = vector.broadcast %c16_i32_205 : i32 to vector<4x512xi32>
    %431 = arith.cmpi slt, %429, %430 : vector<4x512xi32>
    %432 = arith.andi %427, %431 : vector<4x512xi1>
    %c0_i32_206 = arith.constant 0 : i32
    %433 = vector.broadcast %c0_i32_206 : i32 to vector<4x512xi32>
    %434 = arith.addi %2, %433 : vector<4x512xi32>
    %c0_i32_207 = arith.constant 0 : i32
    %435 = vector.broadcast %c0_i32_207 : i32 to vector<4x512xi32>
    %436 = arith.cmpi sge, %434, %435 : vector<4x512xi32>
    %437 = arith.andi %432, %436 : vector<4x512xi1>
    %c0_i32_208 = arith.constant 0 : i32
    %438 = vector.broadcast %c0_i32_208 : i32 to vector<4x512xi32>
    %439 = arith.addi %2, %438 : vector<4x512xi32>
    %c16_i32_209 = arith.constant 16 : i32
    %440 = vector.broadcast %c16_i32_209 : i32 to vector<4x512xi32>
    %441 = arith.cmpi slt, %439, %440 : vector<4x512xi32>
    %442 = arith.andi %437, %441 : vector<4x512xi1>
    %cst_210 = arith.constant 0.000000e+00 : f32
    %443 = vector.broadcast %cst_210 : f32 to vector<4x512xf32>
    %444 = arith.select %442, %423, %443 : vector<4x512xi1>, vector<4x512xf32>
    %c7_211 = arith.constant 7 : index
    %c0_212 = arith.constant 0 : index
    %c0_213 = arith.constant 0 : index
    %445 = vector.load %arg4[%c7_211, %c0_212, %c0_213] : memref<9x4x4xbf16, #tpu.memory_space<vmem>>, vector<1x4x4xbf16>
    %446 = vector.shape_cast %445 : vector<1x4x4xbf16> to vector<4x4xbf16>
    %447 = arith.truncf %444 : vector<4x512xf32> to vector<4x512xbf16>
    %cst_214 = arith.constant dense<0.000000e+00> : vector<4x512xf32>
    %448 = tpu.matmul %446, %447, %cst_214 {dimension_numbers = #tpu.dot_dimension_numbers<[1], [0], [0], [1], [0, 0, 1, 1], [], []>} : vector<4x4xbf16>, vector<4x512xbf16>, vector<4x512xf32> -> vector<4x512xf32>
    %449 = arith.addf %422, %448 : vector<4x512xf32>
    %c495_i32_215 = arith.constant 495 : i32
    %450 = tpu.dynamic_rotate %256 by %c495_i32_215 dim 1 : vector<4x512xf32>, i32 -> vector<4x512xf32>
    %c1_i32_216 = arith.constant 1 : i32
    %451 = vector.broadcast %c1_i32_216 : i32 to vector<4x512xi32>
    %452 = arith.addi %6, %451 : vector<4x512xi32>
    %c0_i32_217 = arith.constant 0 : i32
    %453 = vector.broadcast %c0_i32_217 : i32 to vector<4x512xi32>
    %454 = arith.cmpi sge, %452, %453 : vector<4x512xi32>
    %c1_i32_218 = arith.constant 1 : i32
    %455 = vector.broadcast %c1_i32_218 : i32 to vector<4x512xi32>
    %456 = arith.addi %6, %455 : vector<4x512xi32>
    %c16_i32_219 = arith.constant 16 : i32
    %457 = vector.broadcast %c16_i32_219 : i32 to vector<4x512xi32>
    %458 = arith.cmpi slt, %456, %457 : vector<4x512xi32>
    %459 = arith.andi %454, %458 : vector<4x512xi1>
    %c1_i32_220 = arith.constant 1 : i32
    %460 = vector.broadcast %c1_i32_220 : i32 to vector<4x512xi32>
    %461 = arith.addi %2, %460 : vector<4x512xi32>
    %c0_i32_221 = arith.constant 0 : i32
    %462 = vector.broadcast %c0_i32_221 : i32 to vector<4x512xi32>
    %463 = arith.cmpi sge, %461, %462 : vector<4x512xi32>
    %464 = arith.andi %459, %463 : vector<4x512xi1>
    %c1_i32_222 = arith.constant 1 : i32
    %465 = vector.broadcast %c1_i32_222 : i32 to vector<4x512xi32>
    %466 = arith.addi %2, %465 : vector<4x512xi32>
    %c16_i32_223 = arith.constant 16 : i32
    %467 = vector.broadcast %c16_i32_223 : i32 to vector<4x512xi32>
    %468 = arith.cmpi slt, %466, %467 : vector<4x512xi32>
    %469 = arith.andi %464, %468 : vector<4x512xi1>
    %cst_224 = arith.constant 0.000000e+00 : f32
    %470 = vector.broadcast %cst_224 : f32 to vector<4x512xf32>
    %471 = arith.select %469, %450, %470 : vector<4x512xi1>, vector<4x512xf32>
    %c8_225 = arith.constant 8 : index
    %c0_226 = arith.constant 0 : index
    %c0_227 = arith.constant 0 : index
    %472 = vector.load %arg4[%c8_225, %c0_226, %c0_227] : memref<9x4x4xbf16, #tpu.memory_space<vmem>>, vector<1x4x4xbf16>
    %473 = vector.shape_cast %472 : vector<1x4x4xbf16> to vector<4x4xbf16>
    %474 = arith.truncf %471 : vector<4x512xf32> to vector<4x512xbf16>
    %cst_228 = arith.constant dense<0.000000e+00> : vector<4x512xf32>
    %475 = tpu.matmul %473, %474, %cst_228 {dimension_numbers = #tpu.dot_dimension_numbers<[1], [0], [0], [1], [0, 0, 1, 1], [], []>} : vector<4x4xbf16>, vector<4x512xbf16>, vector<4x512xf32> -> vector<4x512xf32>
    %476 = arith.addf %449, %475 : vector<4x512xf32>
    %cst_229 = arith.constant dense<0.000000e+00> : vector<4xf32>
    %477 = vector.multi_reduction <add>, %476, %cst_229 [1] : vector<4x512xf32> to vector<4xf32>
    %478 = vector.shape_cast %477 : vector<4xf32> to vector<4x1xf32>
    %cst_230 = arith.constant 0.001953125 : f32
    %479 = vector.broadcast %cst_230 : f32 to vector<4x1xf32>
    %480 = arith.mulf %478, %479 : vector<4x1xf32>
    %481 = arith.mulf %476, %476 : vector<4x512xf32>
    %cst_231 = arith.constant dense<0.000000e+00> : vector<4xf32>
    %482 = vector.multi_reduction <add>, %481, %cst_231 [1] : vector<4x512xf32> to vector<4xf32>
    %483 = vector.shape_cast %482 : vector<4xf32> to vector<4x1xf32>
    %cst_232 = arith.constant 0.001953125 : f32
    %484 = vector.broadcast %cst_232 : f32 to vector<4x1xf32>
    %485 = arith.mulf %483, %484 : vector<4x1xf32>
    %486 = arith.mulf %480, %480 : vector<4x1xf32>
    %487 = arith.subf %485, %486 : vector<4x1xf32>
    %c0_233 = arith.constant 0 : index
    %c0_234 = arith.constant 0 : index
    %488 = vector.load %arg5[%c0_233, %c0_234] : memref<4x1xf32, #tpu.memory_space<vmem>>, vector<4x1xf32>
    %cst_235 = arith.constant 9.99999974E-6 : f32
    %489 = vector.broadcast %cst_235 : f32 to vector<4x1xf32>
    %490 = arith.addf %487, %489 : vector<4x1xf32>
    %491 = math.rsqrt %490 : vector<4x1xf32>
    %492 = arith.mulf %488, %491 : vector<4x1xf32>
    %493 = vector.broadcast %492 : vector<4x1xf32> to vector<4x512xf32>
    %494 = arith.mulf %476, %493 : vector<4x512xf32>
    %c0_236 = arith.constant 0 : index
    %c0_237 = arith.constant 0 : index
    %495 = vector.load %arg6[%c0_236, %c0_237] : memref<4x1xf32, #tpu.memory_space<vmem>>, vector<4x1xf32>
    %496 = arith.mulf %480, %492 : vector<4x1xf32>
    %497 = arith.subf %495, %496 : vector<4x1xf32>
    %498 = vector.broadcast %497 : vector<4x1xf32> to vector<4x512xf32>
    %499 = arith.addf %494, %498 : vector<4x512xf32>
    %500 = arith.addf %499, %11 : vector<4x512xf32>
    %501 = vector.extract_strided_slice %500 {offsets = [0, 0], sizes = [4, 256], strides = [1, 1]} : vector<4x512xf32> to vector<4x256xf32>
    %c0_238 = arith.constant 0 : index
    %c0_239 = arith.constant 0 : index
    %c0_240 = arith.constant 0 : index
    %502 = vector.load %arg7[%c0_238, %c0_239, %c0_240] : memref<2x4x256xf32, #tpu.memory_space<vmem>>, vector<1x4x256xf32>
    %503 = vector.shape_cast %502 : vector<1x4x256xf32> to vector<4x256xf32>
    %504 = vector.shape_cast %501 : vector<4x256xf32> to vector<1x4x256xf32>
    tpu.vector_store %arg7[%c0_238, %c0_239, %c0_240], %504 {strides = array<i32>} : memref<2x4x256xf32, #tpu.memory_space<vmem>>, vector<1x4x256xf32>,
    %505 = vector.extract_strided_slice %500 {offsets = [0, 256], sizes = [4, 256], strides = [1, 1]} : vector<4x512xf32> to vector<4x256xf32>
    %c1_241 = arith.constant 1 : index
    %c0_242 = arith.constant 0 : index
    %c0_243 = arith.constant 0 : index
    %506 = vector.load %arg7[%c1_241, %c0_242, %c0_243] : memref<2x4x256xf32, #tpu.memory_space<vmem>>, vector<1x4x256xf32>
    %507 = vector.shape_cast %506 : vector<1x4x256xf32> to vector<4x256xf32>
    %508 = vector.shape_cast %505 : vector<4x256xf32> to vector<1x4x256xf32>
    tpu.vector_store %arg7[%c1_241, %c0_242, %c0_243], %508 {strides = array<i32>} : memref<2x4x256xf32, #tpu.memory_space<vmem>>, vector<1x4x256xf32>,
    return
  }
}

</mosaic_0001>

<bundles_post_ra>
// kernel: tpu_custom_call.1
= control target key start
LH: loop header
LB: loop body
LE: loop exit
PB: predicated region body
PF: predicated region fallthrough
CT: control target
= control target key end

     0   :  { %s2719_s28 = smov 16   ;;  %s3724_s0 = inlined_call_operand.vmem [shape: f32[2,4,256], index: 0, kind: input, shape index: {}]   ;;  %s3725_s1 = inlined_call_operand.vmem [shape: bf16[9,4,4], index: 1, kind: input, shape index: {}]   ;;  %s3726_s2 = inlined_call_operand.vmem [shape: f32[4,1], index: 2, kind: input, shape index: {}]   ;;  %s3727_s3 = inlined_call_operand.vmem [shape: f32[4,1], index: 3, kind: input, shape index: {}]   ;;  %s3728_s4 = inlined_call_operand.vmem [shape: bf16[9,4,4], index: 4, kind: input, shape index: {}]   ;;  %s3729_s5 = inlined_call_operand.vmem [shape: f32[4,1], index: 5, kind: input, shape index: {}]   ;;  %s3730_s6 = inlined_call_operand.vmem [shape: f32[4,1], index: 6, kind: input, shape index: {}]   ;;  %s3731_s7 = inlined_call_operand.hbm [shape: f32[2,4,256], index: 7, kind: output, shape index: {}]  }
   0x1   :  { %v2774_v0 = vld [vmem:[%s3724_s0] sm:$0xff]  ;;  %v2779_v1 = vld [vmem:[%s3724_s0 + $0x8] sm:$0xff] }
   0x2   :  { %v2783_v2 = vcombine.high %v2774_v0, %v2774_v0  ;;  %116 = vrot.lane.b32.xlu1 %v2779_v1, %s2719_s28 }
   0x4   :  { %3786 = vst [vmem:[#allocation5_spill] sm:$0xff] %v2783_v2 }
   0x5   :  { %12 = vsyncpa [#allocation3], 0  ;;  %v3764_v3 = vmov 0   ;;  %v2607_v4 = vpack.i.bf16 %v2783_v2, %v2774_v0  ;;  %v2796_v5 = vcombine.high %v2779_v1, %v2779_v1  ;;  %s2721_s29 = smov 17   ;;  %s2722_s30 = smov 15   ;;  %v28_v6 = vlaneseq }
   0x6   :  { %200 = vmatprep.mubr.bf16.mxu0 %v3764_v3  ;;  %241 = vmatprep.mubr.bf16.mxu1 %v3764_v3  ;;  %s2723_s8 = smov 1   ;;  %s2724_s9 = smov 127   ;;  %v3790_v36 = vmov 0  ;;  %v3792_v42 = vmov 0  ;;  %v3796_v49 = vmov 0  ;;  %v3798_v55 = vmov 0 }
   0x7   :  { %2647 = vset.pattern.permute.xlu0 %v3764_v3  ;;  %2648 = vset.pattern.permute.xlu1 %v3764_v3  ;;  %3787 = vst [vmem:[#allocation6_spill] sm:$0xff] %v2796_v5  ;;  %s2725_s10 = smov 113   ;;  %s2726_s11 = smov 112   ;;  %v2835_v7 = vand.u32 127, %v28_v6  ;;  %v3801_v63 = vmov 0 }
   0x8   :  { %2608 = vrot.lane.b32.xlu0 %v2607_v4, %s2719_s28  ;;  %2613 = vrot.lane.b32.xlu1 %v2607_v4, %s2721_s29  ;;  %s2727_s12 = smov 111  }
   0x9   :  { %v30_v8 = vadd.s32 128, %v2835_v7  ;;  %v31_v9 = vadd.s32 256, %v2835_v7  ;;  %v32_v11 = vadd.s32 384, %v2835_v7  ;;  %v37_v13 = vand.u32 255, %v2835_v7 }
   0xa   :  { %v33_v19 = vand.u32 15, %v2835_v7  ;;  %vm3733_vm2 = vcmp.lt.s32.totalorder %v2835_v7, 16  ;;  %vm3736_vm5 = vcmp.lt.s32.totalorder %v2835_v7, 17 }
   0xb   :  { %v38_v10 = vand.u32 255, %v30_v8  ;;  %v39_v12 = vand.u32 255, %v31_v9  ;;  %v40_v15 = vand.u32 255, %v32_v11  ;;  %v34_v16 = vand.u32 15, %v30_v8 }
   0xc   :  { %118 = vrot.lane.b32.xlu0 %v2796_v5, %s2719_s28  ;;  %58 = vrot.lane.b32.xlu1 %v2779_v1, %s2721_s29  ;;  %v2845_v18 = vshra.s32 %v37_v13, 4  ;;  %v35_v22 = vand.u32 15, %v31_v9  ;;  %v36_v25 = vand.u32 15, %v32_v11  ;;  %v2855_v27 = vadd.s32 4294967295, %v33_v19 }
   0xd   :  { %v2841_v14 = vshra.s32 %v38_v10, 4  ;;  %v2843_v17 = vshra.s32 %v39_v12, 4  ;;  %v2849_v21 = vshra.s32 %v40_v15, 4  ;;  %v2851_v23 = vadd.s32 4294967295, %v34_v16 }
   0xe   :  { %v67_v26 = vadd.s32 4294967295, %v2845_v18  ;;  %v2858_v30 = vadd.s32 4294967295, %v35_v22  ;;  %v2863_v31 = vadd.s32 4294967295, %v36_v25  ;;  %v2870_v33 = vadd.s32 1, %v34_v16 }
   0xf   :  { %v68_v20 = vadd.s32 4294967295, %v2841_v14  ;;  %v69_v24 = vadd.s32 4294967295, %v2843_v17  ;;  %v70_v29 = vadd.s32 4294967295, %v2849_v21  ;;  %vm3732_vm4 = vcmp.ge.s32.totalorder %v2851_v23, 0 }
  0x10   :  { %60 = vrot.lane.b32.xlu0 %v2796_v5, %s2721_s29  ;;  %353 = vrot.lane.b32.xlu1 %v2796_v5, %s2722_s30  ;;  %vm71_vm9 = vcmp.ge.s32.totalorder %v67_v26, 0  ;;  %vm75_vm10 = vcmp.lt.s32.totalorder %v67_v26, 16  ;;  %vm3734_vm15 = vcmp.ge.s32.totalorder %v2858_v30, 0  ;;  %v2881_v37 = vadd.s32 1, %v33_v19 }
  0x11   :  { %vm72_vm0 = vcmp.ge.s32.totalorder %v68_v20, 0  ;;  %vm76_vm1 = vcmp.lt.s32.totalorder %v68_v20, 16  ;;  %vm73_vm6 = vcmp.ge.s32.totalorder %v69_v24, 0  ;;  %vm77_vm7 = vcmp.lt.s32.totalorder %v69_v24, 16 }
  0x12   :  { %vm2865_vm8 = vmand %vm72_vm0, %vm76_vm1  ;;  %vm74_vm13 = vcmp.ge.s32.totalorder %v70_v29, 0  ;;  %vm78_vm14 = vcmp.lt.s32.totalorder %v70_v29, 16  ;;  %v2896_v44 = vadd.s32 1, %v35_v22  ;;  %v2898_v45 = vadd.s32 1, %v36_v25 }
  0x13   :  { %vm2876_vm12 = vmand %vm2865_vm8, %vm3732_vm4  ;;  %vm3735_vm4 = vcmp.ge.s32.totalorder %v2863_v31, 0  ;;  %v3804_v9 = vmov 0  ;;  %v3806_v13 = vmov 0  ;;  %v3814_v24 = vmov 0 }
  0x14   :  { %2618 = vrot.lane.b32.xlu0 %v2607_v4, %s2722_s30  ;;  %2623 = vrot.lane.b32.xlu1 %v2607_v4, %s2723_s8  ;;  %v3791_v36 = vsel %vm2876_vm12, 4294967295, %v3790_v36  ;;  %vm2885_vm0 = vmand %vm73_vm6, %vm77_vm7  ;;  %vm3738_vm7 = vcmp.lt.s32.totalorder %v2870_v33, 16  ;;  %vm3740_vm11 = vcmp.lt.s32.totalorder %v2896_v44, 16  ;;  %v3879_v29 = vmov 0 }
  0x15   :  { %v3793_v42 = vsel %vm2885_vm0, 4294967295, %v3792_v42  ;;  %vm2891_vm1 = vmand %vm71_vm9, %vm75_vm10 }
  0x16   :  { %vm2909_vm6 = vmand %vm74_vm13, %vm78_vm14  ;;  %vm3800_vm13 = vcmp.ge.s32.totalorder %v2855_v27, 0 }
  0x17   :  { %v3797_v49 = vsel %vm2909_vm6, 4294967295, %v3796_v49  ;;  %vm2924_vm9 = vmand %vm2885_vm0, %vm3734_vm15  ;;  %vm3803_vm15 = vcmask 1041408  }
  0x18   :  { %351 = vrot.lane.b32.xlu0 %v2779_v1, %s2722_s30  ;;  %495 = vrot.lane.b32.xlu1 %v2779_v1, %s2723_s8  ;;  %v3799_v55 = vsel %vm2924_vm9, 4294967295, %v3798_v55  ;;  %vm2943_vm14 = vmand %vm2891_vm1, %vm3800_vm13  ;;  %vm3811_vm13 = vcmp.lt.s32.totalorder %v2835_v7, 17 }
  0x19   :  { %v3802_v63 = vsel %vm2943_vm14, 4294967295, %v3801_v63  ;;  %vm2955_vm3 = vmand %vm2909_vm6, %vm3735_vm4 }
  0x1a   :  { %v3805_v9 = vsel %vm2955_vm3, 4294967295, %v3804_v9  ;;  %vm3007_vm4 = vmand %vm2885_vm0, %vm3740_vm11 }
  0x1c   :  { %497 = vrot.lane.b32.xlu0 %v2796_v5, %s2723_s8  ;;  %746 = vrot.lane.b32.xlu1 %v2779_v1, %s2724_s9 }
  0x20   :  { %2628 = vrot.lane.b32.xlu0 %v2607_v4, %s2724_s9  ;;  %2633 = vrot.lane.b32.xlu1 %v2607_v4, %s2725_s10 }
  0x24   :  { %748 = vrot.lane.b32.xlu0 %v2796_v5, %s2724_s9  ;;  %880 = vrot.lane.b32.xlu1 %v2796_v5, %s2725_s10 }
  0x28   :  { %878 = vrot.lane.b32.xlu0 %v2779_v1, %s2725_s10  ;;  %1026 = vrot.lane.b32.xlu1 %v2779_v1, %s2726_s11 }
  0x2c   :  { %2638 = vrot.lane.b32.xlu0 %v2607_v4, %s2726_s11  ;;  %2643 = vrot.lane.b32.xlu1 %v2607_v4, %s2727_s12 }
  0x30   :  { %1028 = vrot.lane.b32.xlu0 %v2796_v5, %s2726_s11  ;;  %1160 = vrot.lane.b32.xlu1 %v2796_v5, %s2727_s12 }
  0x34   :  { %1158 = vrot.lane.b32.xlu0 %v2779_v1, %s2727_s12 }
  0x74   :  { %v117_v28 = vpop.permute.xlu1 %116 }
  0x7a   :  { %v2609_v34 = vpop.permute.xlu0 %2608  ;;  %v2614_v35 = vpop.permute.xlu1 %2613 }
  0x7b   :  { %v2611_v38 = vunpack.i.h.bf16 %v2609_v34  ;;  %v2610_v39 = vunpack.i.l.bf16 %v2609_v34  ;;  %v2616_v40 = vunpack.i.h.bf16 %v2614_v35  ;;  %v2615_v41 = vunpack.i.l.bf16 %v2614_v35 }
  0x7d   :  { %v122_v46 = vsel %vm3733_vm2, %v2611_v38, %v117_v28  ;;  %v123_v47 = vsel %vm3733_vm2, %v2610_v39, %v2611_v38  ;;  %v65_v48 = vsel %vm3736_vm5, %v2615_v41, %v2616_v40  ;;  %v3821_v38 = vmov 0 }
  0x7e   :  { %v119_v50 = vpop.permute.xlu0 %118  ;;  %v142_v51 = vsel %vm2865_vm8, %v123_v47, 0.0  ;;  %v104_v52 = vsel %vm2876_vm12, %v65_v48, 0.0  ;;  %v143_v53 = vsel %vm2885_vm0, %v122_v46, 0.0  ;;  %v59_v54 = vpop.permute.xlu1 %58  ;;  %v3822_v38 = vsel %vm3007_vm4, 4294967295, %v3821_v38 }
  0x7f   :  { %v121_v56 = vsel %vm3733_vm2, %v117_v28, %v119_v50  ;;  %v124_v57 = vsel %vm3733_vm2, %v119_v50, %v2610_v39  ;;  %v148_v58 = vpack.c.bf16 %v142_v51, %v142_v51  ;;  %v149_v59 = vpack.c.bf16 %v143_v53, %v143_v53  ;;  %v2507_v28 = vld [vmem:[%s3725_s1 + $0x2] sm:$0x3] }
  0x80   :  { %v144_v60 = vsel %vm2909_vm6, %v121_v56, 0.0  ;;  %v141_v61 = vsel %vm2891_vm1, %v124_v57, 0.0  ;;  %v64_v62 = vsel %vm3736_vm5, %v2616_v40, %v59_v54  ;;  %v109_v10 = vpack.c.bf16 %v104_v52, %v104_v52 }
  0x81   :  { %2508 = vmatprep.subr.msk.bf16.mxu0 %vm3803_vm15, %v148_v58  ;;  %v150_v4 = vpack.c.bf16 %v144_v60, %v144_v60  ;;  %v147_v6 = vpack.c.bf16 %v141_v61, %v141_v61  ;;  %v105_v8 = vsel %vm2924_vm9, %v64_v62, 0.0  ;;  %vm2964_vm15 = vmand %vm2865_vm8, %vm3738_vm7  ;;  %vm3808_vm2 = vcmask 1041408  }
  0x82   :  { %v110_v11 = vpack.c.bf16 %v105_v8, %v105_v8  ;;  %v61_v12 = vpop.permute.xlu0 %60  ;;  %v3807_v13 = vsel %vm2964_vm15, 4294967295, %v3806_v13  ;;  %v354_v15 = vpop.permute.xlu1 %353  ;;  %vm3809_vm10 = vmmov %vm3808_vm2  ;;  %vm3813_vm7 = vcmp.lt.s32.totalorder %v2881_v37, 16  ;;  %v3831_v52 = vmov 0 }
  0x83   :  { %2510 = vmatprep.subr.msk.bf16.mxu1 %vm3808_vm2, %v150_v4  ;;  %v157_v16 = vsel %vm3809_vm10, %v147_v6, 0  ;;  %vm3810_vm5 = vmmov %vm3808_vm2  ;;  %v63_v20 = vsel %vm3811_vm13, %v59_v54, %v61_v12  ;;  %vm3824_vm10 = vcmp.lt.s32.totalorder %v2898_v45, 16  ;;  %v887_v6 = vadd.s32 1, %v2845_v18 }
  0x84   :  { %v163_v19 = vsel %vm3810_vm5, %v149_v59, 0  ;;  %vm3812_vm9 = vmmov %vm3811_vm13  ;;  %183 = vmatpush1.bf16.msra.mxu0 %v157_v16  ;;  %v106_v26 = vsel %vm2955_vm3, %v63_v20, 0.0  ;;  %vm3816_vm5 = vcmp.lt.s32.totalorder %v2841_v14, 16  ;;  %vm508_vm3 = vcmp.lt.s32.totalorder %v2845_v18, 16  ;;  %v107_v20 = vld [vmem:[%s3725_s1] sm:$0x3] }
  0x85   :  { %v66_v22 = vsel %vm3812_vm9, %v61_v12, %v2615_v41  ;;  %vm2981_vm12 = vmand %vm2891_vm1, %vm3813_vm7  ;;  %224 = vmatpush1.bf16.msra.mxu1 %v163_v19  ;;  %vm3817_vm7 = vcmp.ge.s32.totalorder %v2841_v14, 0  ;;  %v111_v35 = vpack.c.bf16 %v106_v26, %v106_v26  ;;  %v3825_v41 = vmov 0 }
  0x86   :  { %v3815_v24 = vsel %vm2981_vm12, 4294967295, %v3814_v24  ;;  %v103_v25 = vsel %vm2943_vm14, %v66_v22, 0.0  ;;  %vm2997_vm9 = vmand %vm3817_vm7, %vm3816_vm5  ;;  %v2619_v39 = vpop.permute.xlu0 %2618  ;;  %v2624_v46 = vpop.permute.xlu1 %2623  ;;  %vm3827_vm14 = vcmask 31744   ;;  %v3850_v16 = vmov 0 }
  0x87   :  { %v108_v34 = vpack.c.bf16 %v103_v25, %v103_v25  ;;  %vm3820_vm13 = vmmov %vm3808_vm2  ;;  %2509 = vmatmul.mubr.msk.bf16.vlgmr.msra.gmra.mxu0 %vm3827_vm14, %v2507_v28  ;;  %v2621_v47 = vunpack.i.h.bf16 %v2619_v39  ;;  %v2620_v48 = vunpack.i.l.bf16 %v2619_v39  ;;  %v2626_v51 = vunpack.i.h.bf16 %v2624_v46 }
  0x88   :  { %2512 = vmatprep.subr.msk.bf16.mxu0 %vm3820_vm13, %v109_v10  ;;  %vm3823_vm7 = vmmov %vm3808_vm2  ;;  %v2625_v53 = vunpack.i.l.bf16 %v2624_v46  ;;  %297 = vmatprep.mubr.bf16.mxu0 %v3764_v3  ;;  %v3854_v26 = vmov 0  ;;  %v3858_v39 = vmov 0  ;;  %v3889_v58 = vmov 0 }
  0x89   :  { %v260_v40 = vsel %vm3823_vm7, %v110_v11, 0  ;;  %vm3018_vm13 = vmand %vm2909_vm6, %vm3824_vm10  ;;  %vm3830_vm10 = vcmp.ge.s32.totalorder %v2851_v23, 0 }
  0x8a   :  { %v3826_v41 = vsel %vm3018_vm13, 4294967295, %v3825_v41  ;;  %vm3828_vm5 = vmmov %vm3827_vm14  ;;  %vm3834_vm14 = vcmp.lt.s32.totalorder %v2843_v17, 16  ;;  %v352_v61 = vpop.permute.xlu0 %351  ;;  %v496_v4 = vpop.permute.xlu1 %495 }
  0x8b   :  { %2511 = vmatmul.mubr.msk.bf16.vlgmr.msra.gmra.mxu1 %vm3828_vm5, %v2507_v28  ;;  %vm3829_vm7 = vmmov %vm3808_vm2  ;;  %vm3835_vm5 = vcmp.ge.s32.totalorder %v2843_v17, 0 }
  0x8c   :  { %v254_v50 = vsel %vm3829_vm7, %v108_v34, 0  ;;  %vm3032_vm6 = vmand %vm2997_vm9, %vm3830_vm10  ;;  %vm3838_vm7 = vcmp.lt.s32.totalorder %v2835_v7, 15  ;;  %338 = vmatprep.mubr.bf16.mxu1 %v3764_v3 }
  0x8d   :  { %v3832_v52 = vsel %vm3032_vm6, 4294967295, %v3831_v52  ;;  %vm3833_vm11 = vmmov %vm3808_vm2  ;;  %280 = vmatpush1.bf16.msra.mxu0 %v254_v50  ;;  %v358_v56 = vsel %vm3838_vm7, %v2620_v48, %v2621_v47 }
  0x8e   :  { %2514 = vmatprep.subr.msk.bf16.mxu1 %vm3833_vm11, %v111_v35  ;;  %vm3041_vm2 = vmand %vm3835_vm5, %vm3834_vm14  ;;  %vm3840_vm11 = vcmp.ge.s32.totalorder %v2845_v18, 0  ;;  %v381_v59 = vsel %vm2964_vm15, %v358_v56, 0.0  ;;  %vm3843_vm14 = vcmp.lt.s32.totalorder %v2835_v7, 1  ;;  %vm3844_vm5 = vcmp.lt.s32.totalorder %v2849_v21, 16  ;;  %v498_v46 = vpop.permute.xlu0 %497 }
  0x8f   :  { %321 = vmatpush1.bf16.msra.mxu1 %v260_v40  ;;  %vm3839_vm10 = vmmov %vm3838_vm7  ;;  %v502_v62 = vsel %vm3843_vm14, %v2625_v53, %v2626_v51  ;;  %vm3849_vm14 = vcmp.ge.s32.totalorder %v2858_v30, 0  ;;  %v387_v22 = vpack.c.bf16 %v381_v59, %v381_v59 }
  0x90   :  { %v359_v57 = vsel %vm3839_vm10, %v354_v15, %v2620_v48  ;;  %vm3054_vm0 = vmand %vm3840_vm11, %vm508_vm3  ;;  %vm3845_vm3 = vcmp.ge.s32.totalorder %v2849_v21, 0  ;;  %v356_v10 = vsel %vm3839_vm10, %v352_v61, %v354_v15  ;;  %v525_v12 = vsel %vm3032_vm6, %v502_v62, 0.0  ;;  %v747_v62 = vpop.permute.xlu1 %746 }
  0x91   :  { %v380_v60 = vsel %vm2981_vm12, %v359_v57, 0.0  ;;  %vm3069_vm7 = vmand %vm3845_vm3, %vm3844_vm5  ;;  %v383_v15 = vsel %vm3018_vm13, %v356_v10, 0.0  ;;  %vm3852_vm5 = vcmp.lt.s32.totalorder %v2835_v7, 1  ;;  %vm3853_vm3 = vcmp.ge.s32.totalorder %v2855_v27, 0 }
  0x92   :  { %v386_v8 = vpack.c.bf16 %v380_v60, %v380_v60  ;;  %vm3848_vm11 = vmmov %vm3839_vm10  ;;  %v501_v25 = vsel %vm3852_vm5, %v2626_v51, %v496_v4  ;;  %v389_v34 = vpack.c.bf16 %v383_v15, %v383_v15  ;;  %v888_v15 = vadd.s32 1, %v2841_v14 }
  0x93   :  { %v357_v11 = vsel %vm3848_vm11, %v2621_v47, %v352_v61  ;;  %vm3083_vm12 = vmand %vm3041_vm2, %vm3849_vm14  ;;  %vm3856_vm11 = vcmask 1041408   ;;  %vm3857_vm14 = vcmp.ge.s32.totalorder %v2863_v31, 0  ;;  %v531_v47 = vpack.c.bf16 %v525_v12, %v525_v12 }
  0x94   :  { %v3851_v16 = vsel %vm3083_vm12, 4294967295, %v3850_v16  ;;  %v382_v19 = vsel %vm3007_vm4, %v357_v11, 0.0  ;;  %vm3100_vm10 = vmand %vm3054_vm0, %vm3853_vm3  ;;  %v394_v35 = vsel %vm3856_vm11, %v386_v8, 0  ;;  %v526_v40 = vsel %vm3083_vm12, %v501_v25, 0.0  ;;  %v2516_v8 = vld [vmem:[%s3725_s1 + $0x4] sm:$0x3]  ;;  %v2634_v14 = vpop.permute.xlu1 %2633 }
  0x95   :  { %v3855_v26 = vsel %vm3100_vm10, 4294967295, %v3854_v26  ;;  %v388_v28 = vpack.c.bf16 %v382_v19, %v382_v19  ;;  %vm3109_vm6 = vmand %vm3069_vm7, %vm3857_vm14  ;;  %vm3862_vm3 = vcmask 31744   ;;  %vm3865_vm4 = vcmp.lt.s32.totalorder %v2835_v7, 1 }
  0x96   :  { %v3859_v39 = vsel %vm3109_vm6, 4294967295, %v3858_v39  ;;  %vm3861_vm5 = vmmov %vm3856_vm11  ;;  %2513 = vmatmul.mubr.msk.bf16.vlgmr.msra.gmra.mxu0 %vm3862_vm3, %v107_v20  ;;  %v500_v50 = vsel %vm3865_vm4, %v496_v4, %v498_v46  ;;  %v532_v59 = vpack.c.bf16 %v526_v40, %v526_v40  ;;  %v890_v4 = vadd.s32 1, %v2849_v21 }
  0x97   :  { %3860 = vst [vmem:[#allocation7_spill] sm:$0xff] %v3859_v39  ;;  %2517 = vmatprep.subr.msk.bf16.mxu0 %vm3861_vm5, %v387_v22  ;;  %vm3863_vm13 = vmmov %vm3862_vm3  ;;  %v527_v57 = vsel %vm3109_vm6, %v500_v50, 0.0  ;;  %437 = vmatprep.mubr.bf16.mxu0 %v3764_v3  ;;  %vm3750_vm3 = vcmp.lt.s32.totalorder %v2835_v7, 127  ;;  %v640_v21 = vpack.c.bf16 %v2796_v5, %v2796_v5  ;;  %v889_v25 = vadd.s32 1, %v2843_v17 }
  0x98   :  { %2515 = vmatmul.mubr.msk.bf16.vlgmr.msra.gmra.mxu1 %vm3863_vm13, %v107_v20  ;;  %vm3864_vm11 = vmmov %vm3861_vm5  ;;  %420 = vmatpush1.bf16.msra.mxu0 %v394_v35  ;;  %v533_v61 = vpack.c.bf16 %v527_v57, %v527_v57  ;;  %v638_v20 = vpack.c.bf16 %v2783_v2, %v2783_v2  ;;  %v637_v17 = vpack.c.bf16 %v2774_v0, %v2774_v0  ;;  %v3883_v0 = vmov 0 }
  0x99   :  { %v400_v48 = vsel %vm3864_vm11, %v388_v28, 0  ;;  %vm3866_vm14 = vmmov %vm3865_vm4  ;;  %478 = vmatprep.mubr.bf16.mxu1 %v3764_v3  ;;  %vm3872_vm11 = vcmask 31744   ;;  %v3875_v28 = vmov 0  ;;  %v639_v40 = vpack.c.bf16 %v2779_v1, %v2779_v1 }
  0x9a   :  { %v503_v51 = vsel %vm3866_vm14, %v498_v46, %v2625_v53  ;;  %vm3867_vm15 = vmmov %vm3861_vm5  ;;  %v2629_v53 = vpop.permute.xlu0 %2628  ;;  %v2636_v57 = vunpack.i.h.bf16 %v2634_v14  ;;  %vm895_vm12 = vcmp.lt.s32.totalorder %v887_v6, 16 }
  0x9b   :  { %2519 = vmatprep.subr.msk.bf16.mxu1 %vm3867_vm15, %v389_v34  ;;  %v524_v56 = vsel %vm3100_vm10, %v503_v51, 0.0  ;;  %vm3868_vm4 = vmmov %vm3861_vm5  ;;  %v2631_v10 = vunpack.i.h.bf16 %v2629_v53  ;;  %v2630_v11 = vunpack.i.l.bf16 %v2629_v53  ;;  %vm3892_vm10 = vcmp.lt.s32.totalorder %v2835_v7, 127  ;;  %v2521_v51 = vld [vmem:[%s3725_s1 + $0x6] sm:$0x3] }
  0x9c   :  { %461 = vmatpush1.bf16.msra.mxu1 %v400_v48  ;;  %v530_v60 = vpack.c.bf16 %v524_v56, %v524_v56  ;;  %2522 = vmatprep.subr.msk.bf16.mxu0 %vm3868_vm4, %v531_v47  ;;  %vm3869_vm15 = vmmov %vm3868_vm4  ;;  %v3895_v48 = vmov 0 }
  0x9d   :  { %2524 = vmatprep.subr.msk.bf16.mxu1 %vm3869_vm15, %v533_v61  ;;  %vm3870_vm13 = vmmov %vm3868_vm4  ;;  %v752_v34 = vsel %vm3750_vm3, %v2631_v10, %v747_v62  ;;  %v753_v1 = vsel %vm3892_vm10, %v2630_v11, %v2631_v10  ;;  %v881_v61 = vpop.permute.xlu1 %880 }
  0x9e   :  { %v538_v12 = vsel %vm3870_vm13, %v530_v60, 0  ;;  %vm3871_vm5 = vmmov %vm3868_vm4  ;;  %v749_v22 = vpop.permute.xlu0 %748  ;;  %2518 = vmatmul.mubr.msk.bf16.vlgmr.msra.gmra.mxu0 %vm3872_vm11, %v2516_v8  ;;  %vm3874_vm4 = vcmp.lt.s32.totalorder %v2870_v33, 16  ;;  %v3900_v60 = vmov 0 }
  0x9f   :  { %v544_v19 = vsel %vm3871_vm5, %v532_v59, 0  ;;  %vm3873_vm14 = vmmov %vm3872_vm11  ;;  %vm898_vm5 = vcmp.lt.s32.totalorder %v890_v4, 16  ;;  %564 = vmatpush1.bf16.msra.mxu0 %v538_v12  ;;  %v754_v35 = vsel %vm3750_vm3, %v749_v22, %v2630_v11  ;;  %vm3878_vm11 = vcmp.lt.s32.totalorder %v2898_v45, 16  ;;  %581 = vmatprep.mubr.bf16.mxu0 %v3764_v3 }
  0xa0   :  { %2520 = vmatmul.mubr.msk.bf16.vlgmr.msra.gmra.mxu1 %vm3873_vm14, %v2516_v8  ;;  %vm3151_vm15 = vmand %vm2997_vm9, %vm3874_vm4  ;;  %vm3882_vm14 = vcmp.lt.s32.totalorder %v2881_v37, 16  ;;  %v2635_v59 = vunpack.i.l.bf16 %v2634_v14  ;;  %v3916_v11 = vmov 0 }
  0xa1   :  { %v3876_v28 = vsel %vm3151_vm15, 4294967295, %v3875_v28  ;;  %605 = vmatpush1.bf16.msra.mxu1 %v544_v19  ;;  %vm3165_vm9 = vmand %vm3069_vm7, %vm3878_vm11  ;;  %622 = vmatprep.mubr.bf16.mxu1 %v3764_v3  ;;  %vm896_vm7 = vcmp.lt.s32.totalorder %v888_v15, 16  ;;  %v764_v47 = vsel %vm3151_vm15, %v752_v34, 0.0 }
  0xa2   :  { %3877 = vst [vmem:[#allocation8_spill] sm:$0xff] %v3876_v28  ;;  %v3880_v29 = vsel %vm3165_vm9, 4294967295, %v3879_v29  ;;  %vm3173_vm4 = vmand %vm3054_vm0, %vm3882_vm14  ;;  %vm3888_vm0 = vcmp.ge.s32.totalorder %v890_v4, 0  ;;  %v879_v46 = vpop.permute.xlu0 %878  ;;  %v766_v50 = vsel %vm3165_vm9, %v754_v35, 0.0  ;;  %v770_v53 = vpack.c.bf16 %v764_v47, %v764_v47 }
  0xa3   :  { %3881 = vst [vmem:[#allocation9_spill] sm:$0xff] %v3880_v29  ;;  %v3884_v0 = vsel %vm3173_vm4, 4294967295, %v3883_v0  ;;  %vm3886_vm11 = vmmov %vm3870_vm13  ;;  %v772_v8 = vpack.c.bf16 %v766_v50, %v766_v50  ;;  %v763_v10 = vsel %vm3173_vm4, %v753_v1, 0.0 }
  0xa4   :  { %3885 = vst [vmem:[#allocation10_spill] sm:$0xff] %v3884_v0  ;;  %2527 = vmatprep.subr.msk.bf16.mxu0 %vm3886_vm11, %v638_v20  ;;  %vm3887_vm13 = vmmov %vm3886_vm11  ;;  %v3922_v20 = vmov 0 }
  0xa5   :  { %2529 = vmatprep.subr.msk.bf16.mxu1 %vm3887_vm13, %v640_v21  ;;  %vm3186_vm14 = vmand %vm3888_vm0, %vm898_vm5  ;;  %vm3894_vm13 = vcmp.lt.s32.totalorder %v2896_v44, 16  ;;  %v769_v21 = vpack.c.bf16 %v763_v10, %v763_v10 }
  0xa6   :  { %v3890_v58 = vsel %vm3186_vm14, 4294967295, %v3889_v58  ;;  %vm3893_vm3 = vmmov %vm3892_vm10  ;;  %v2639_v12 = vpop.permute.xlu0 %2638 }
  0xa7   :  { %3891 = vst [vmem:[#allocation11_spill] sm:$0xff] %v3890_v58  ;;  %v751_v18 = vsel %vm3893_vm3, %v747_v62, %v749_v22  ;;  %vm3200_vm5 = vmand %vm3041_vm2, %vm3894_vm13  ;;  %vm3899_vm3 = vcmp.ge.s32.totalorder %v888_v15, 0  ;;  %vm3904_vm13 = vcmp.ge.s32.totalorder %v2863_v31, 0  ;;  %v3905_v62 = vmov 0  ;;  %v1027_v22 = vpop.permute.xlu1 %1026 }
  0xa8   :  { %v3896_v48 = vsel %vm3200_vm5, 4294967295, %v3895_v48  ;;  %vm3898_vm10 = vmmov %vm3886_vm11  ;;  %v765_v4 = vsel %vm3200_vm5, %v751_v18, 0.0  ;;  %v3910_v31 = vmov 0  ;;  %v2640_v1 = vunpack.i.l.bf16 %v2639_v12 }
  0xa9   :  { %3897 = vst [vmem:[#allocation12_spill] sm:$0xff] %v3896_v48  ;;  %v645_v56 = vsel %vm3898_vm10, %v637_v17, 0  ;;  %vm3212_vm11 = vmand %vm3899_vm3, %vm896_vm7  ;;  %vm3908_vm7 = vcmp.lt.s32.totalorder %v889_v25, 16  ;;  %vm3909_vm3 = vcmp.ge.s32.totalorder %v889_v25, 0  ;;  %v3928_v25 = vmov 0 }
  0xaa   :  { %v3901_v60 = vsel %vm3212_vm11, 4294967295, %v3900_v60  ;;  %vm3903_vm2 = vmmov %vm3898_vm10  ;;  %vm3915_vm10 = vcmp.ge.s32.totalorder %v2851_v23, 0  ;;  %v771_v23 = vpack.c.bf16 %v765_v4, %v765_v4  ;;  %v1029_v18 = vpop.permute.xlu0 %1028 }
  0xab   :  { %3902 = vst [vmem:[#allocation13_spill] sm:$0xff] %v3901_v60  ;;  %v651_v54 = vsel %vm3903_vm2, %v639_v40, 0  ;;  %vm3222_vm6 = vmand %vm3186_vm14, %vm3904_vm13  ;;  %vm3913_vm13 = vcmask 31744   ;;  %v2526_v40 = vld [vmem:[%s3725_s1 + $0x8] sm:$0x3] }
  0xac   :  { %v3906_v62 = vsel %vm3222_vm6, 4294967295, %v3905_v62  ;;  %vm3232_vm2 = vmand %vm3909_vm3, %vm3908_vm7  ;;  %2523 = vmatmul.mubr.msk.bf16.vlgmr.msra.gmra.mxu0 %vm3913_vm13, %v2521_v51  ;;  %vm3919_vm7 = vcmp.lt.s32.totalorder %v2835_v7, 113 }
  0xad   :  { %3907 = vst [vmem:[#allocation14_spill] sm:$0xff] %v3906_v62  ;;  %v3911_v31 = vsel %vm3232_vm2, 4294967295, %v3910_v31  ;;  %vm3914_vm0 = vmmov %vm3913_vm13  ;;  %671 = vmatpush1.bf16.msra.mxu0 %v645_v56  ;;  %v886_v19 = vsel %vm3919_vm7, %v881_v61, %v2635_v59  ;;  %vm3921_vm13 = vcmp.ge.s32.totalorder %v887_v6, 0  ;;  %688 = vmatprep.mubr.bf16.mxu0 %v3764_v3  ;;  %v2641_v6 = vunpack.i.h.bf16 %v2639_v12 }
  0xae   :  { %3912 = vst [vmem:[#allocation15_spill] sm:$0xff] %v3911_v31  ;;  %2525 = vmatmul.mubr.msk.bf16.vlgmr.msra.gmra.mxu1 %vm3914_vm0, %v2521_v51  ;;  %vm3242_vm9 = vmand %vm3212_vm11, %vm3915_vm10  ;;  %vm3925_vm0 = vcmask 1041408   ;;  %v914_v17 = vsel %vm3222_vm6, %v886_v19, 0.0  ;;  %v2531_v19 = vld [vmem:[%s3725_s1 + $0xa] sm:$0x3] }
  0xaf   :  { %v3917_v11 = vsel %vm3242_vm9, 4294967295, %v3916_v11  ;;  %712 = vmatpush1.bf16.msra.mxu1 %v651_v54  ;;  %vm3920_vm3 = vmmov %vm3919_vm7  ;;  %729 = vmatprep.mubr.bf16.mxu1 %v3764_v3  ;;  %vm3927_vm7 = vcmp.ge.s32.totalorder %v2858_v30, 0  ;;  %v3934_v30 = vmov 0 }
  0xb0   :  { %3918 = vst [vmem:[#allocation16_spill] sm:$0xff] %v3917_v11  ;;  %v884_v15 = vsel %vm3920_vm3, %v2636_v57, %v879_v46  ;;  %vm3251_vm5 = vmand %vm3921_vm13, %vm895_vm12  ;;  %2532 = vmatprep.subr.msk.bf16.mxu0 %vm3925_vm0, %v770_v53  ;;  %vm3931_vm12 = vcmp.lt.s32.totalorder %v2835_v7, 113 }
  0xb1   :  { %v3923_v20 = vsel %vm3251_vm5, 4294967295, %v3922_v20  ;;  %vm3926_vm10 = vmmov %vm3925_vm0  ;;  %v885_v14 = vsel %vm3931_vm12, %v2635_v59, %v2636_v57  ;;  %v912_v35 = vsel %vm3242_vm9, %v884_v15, 0.0  ;;  %vm3933_vm0 = vcmp.ge.s32.totalorder %v2855_v27, 0  ;;  %v2644_v57 = vpop.permute.xlu1 %2643 }
  0xb2   :  { %3924 = vst [vmem:[#allocation17_spill] sm:$0xff] %v3923_v20  ;;  %2534 = vmatprep.subr.msk.bf16.mxu1 %vm3926_vm10, %v772_v8  ;;  %vm3263_vm3 = vmand %vm3232_vm2, %vm3927_vm7  ;;  %vm3937_vm7 = vcmask 1041408   ;;  %v920_v27 = vpack.c.bf16 %v914_v17, %v914_v17  ;;  %v918_v51 = vpack.c.bf16 %v912_v35, %v912_v35  ;;  %v2646_v15 = vunpack.i.h.bf16 %v2644_v57 }
  0xb3   :  { %v3929_v25 = vsel %vm3263_vm3, 4294967295, %v3928_v25  ;;  %vm3932_vm13 = vmmov %vm3931_vm12  ;;  %v777_v47 = vsel %vm3937_vm7, %v769_v21, 0 }
  0xb4   :  { %3930 = vst [vmem:[#allocation18_spill] sm:$0xff] %v3929_v25  ;;  %v883_v34 = vsel %vm3932_vm13, %v879_v46, %v881_v61  ;;  %vm3279_vm10 = vmand %vm3251_vm5, %vm3933_vm0  ;;  %vm3757_vm13 = vcmp.lt.s32.totalorder %v2835_v7, 112  ;;  %vm3939_vm0 = vcmask 31744  }
  0xb5   :  { %v3935_v30 = vsel %vm3279_vm10, 4294967295, %v3934_v30  ;;  %vm3938_vm12 = vmmov %vm3937_vm7  ;;  %v913_v50 = vsel %vm3263_vm3, %v883_v34, 0.0  ;;  %v911_v56 = vsel %vm3279_vm10, %v885_v14, 0.0  ;;  %2528 = vmatmul.mubr.msk.bf16.vlgmr.msra.gmra.mxu0 %vm3939_vm0, %v2526_v40  ;;  %v1032_v59 = vsel %vm3757_vm13, %v2641_v6, %v1027_v22  ;;  %v1161_v17 = vpop.permute.xlu1 %1160  ;;  %v1159_v34 = vpop.permute.xlu0 %1158 }
  0xb6   :  { %3936 = vst [vmem:[#allocation19_spill] sm:$0xff] %v3935_v30  ;;  %v783_v46 = vsel %vm3938_vm12, %v771_v23, 0  ;;  %vm3940_vm6 = vmmov %vm3939_vm0  ;;  %803 = vmatpush1.bf16.msra.mxu0 %v777_v47  ;;  %v1034_v54 = vsel %vm3757_vm13, %v1029_v18, %v2640_v1  ;;  %v919_v61 = vpack.c.bf16 %v913_v50, %v913_v50  ;;  %820 = vmatprep.mubr.bf16.mxu0 %v3764_v3  ;;  %v1044_v8 = vsel %vm3212_vm11, %v1032_v59, 0.0  ;;  %v2536_v59 = vld [vmem:[%s3725_s1 + $0xc] sm:$0x3] }
  0xb7   :  { %2530 = vmatmul.mubr.msk.bf16.vlgmr.msra.gmra.mxu1 %vm3940_vm6, %v2526_v40  ;;  %v917_v53 = vpack.c.bf16 %v911_v56, %v911_v56  ;;  %2537 = vmatprep.subr.msk.bf16.mxu0 %vm3937_vm7, %v918_v51  ;;  %vm3941_vm12 = vmmov %vm3937_vm7  ;;  %v1033_v4 = vsel %vm3757_vm13, %v2640_v1, %v2641_v6  ;;  %v1031_v10 = vsel %vm3757_vm13, %v1027_v22, %v1029_v18  ;;  %v1046_v12 = vsel %vm3186_vm14, %v1034_v54, 0.0 }
  0xb8   :  { %844 = vmatpush1.bf16.msra.mxu1 %v783_v46  ;;  %861 = vmatprep.mubr.bf16.mxu1 %v3764_v3  ;;  %v2645_v23 = vunpack.i.l.bf16 %v2644_v57  ;;  %vm3942_vm6 = vmmov %vm3937_vm7  ;;  %vm3759_vm7 = vcmp.lt.s32.totalorder %v2835_v7, 111  ;;  %v1050_v35 = vpack.c.bf16 %v1044_v8, %v1044_v8  ;;  %v1045_v22 = vsel %vm3232_vm2, %v1031_v10, 0.0 }
  0xb9   :  { %2539 = vmatprep.subr.msk.bf16.mxu1 %vm3941_vm12, %v920_v27  ;;  %v925_v21 = vsel %vm3942_vm6, %v917_v53, 0  ;;  %vm3943_vm0 = vmmov %vm3942_vm6  ;;  %v1052_v40 = vpack.c.bf16 %v1046_v12, %v1046_v12  ;;  %v1043_v6 = vsel %vm3251_vm5, %v1033_v4, 0.0  ;;  %vm3944_vm12 = vcmask 31744  }
  0xba   :  { %v931_v14 = vsel %vm3943_vm0, %v919_v61, 0  ;;  %vm3945_vm13 = vmmov %vm3944_vm12  ;;  %vm3946_vm6 = vcmp.lt.s32.totalorder %v2898_v45, 16  ;;  %v3947_v1 = vmov 0  ;;  %v1166_v47 = vsel %vm3759_vm7, %v1161_v17, %v2645_v23 }
  0xbb   :  { %vm3327_vm0 = vmand %vm3186_vm14, %vm3946_vm6  ;;  %v1164_v46 = vsel %vm3759_vm7, %v2646_v15, %v1159_v34  ;;  %v3951_v45 = vmov 0  ;;  %v1051_v18 = vpack.c.bf16 %v1045_v22, %v1045_v22  ;;  %v1049_v27 = vpack.c.bf16 %v1043_v6, %v1043_v6 }
  0xbc   :  { %v3948_v1 = vsel %vm3327_vm0, 4294967295, %v3947_v1  ;;  %vm3954_vm6 = vcmask 1041408   ;;  %vm3956_vm7 = vcmp.lt.s32.totalorder %v2896_v44, 16  ;;  %v1178_v51 = vsel %vm3327_vm0, %v1166_v47, 0.0 }
  0xbd   :  { %2533 = vmatmul.mubr.msk.bf16.vlgmr.msra.gmra.mxu0 %vm3944_vm12, %v2531_v19  ;;  %3949 = vst [vmem:[#allocation20_spill] sm:$0xff] %v3948_v1  ;;  %vm3950_vm12 = vcmp.lt.s32.totalorder %v2870_v33, 16  ;;  %vm3955_vm14 = vmmov %vm3954_vm6  ;;  %v3957_v33 = vmov 0  ;;  %v3963_v44 = vmov 0  ;;  %v1057_v54 = vsel %vm3954_vm6, %v1049_v27, 0 }
  0xbe   :  { %951 = vmatpush1.bf16.msra.mxu0 %v925_v21  ;;  %968 = vmatprep.mubr.bf16.mxu0 %v3764_v3  ;;  %vm3351_vm3 = vmand %vm3232_vm2, %vm3956_vm7  ;;  %v1184_v53 = vpack.c.bf16 %v1178_v51, %v1178_v51  ;;  %v2546_v21 = vld [vmem:[%s3725_s1 + $0x10] sm:$0x3] }
  0xbf   :  { %2535 = vmatmul.mubr.msk.bf16.vlgmr.msra.gmra.mxu1 %vm3945_vm13, %v2531_v19  ;;  %vm3339_vm13 = vmand %vm3212_vm11, %vm3950_vm12  ;;  %2542 = vmatprep.subr.msk.bf16.mxu0 %vm3954_vm6, %v1050_v35  ;;  %v3958_v33 = vsel %vm3351_vm3, 4294967295, %v3957_v33  ;;  %vm3960_vm12 = vcmp.lt.s32.totalorder %v2835_v7, 111  ;;  %v2541_v19 = vld [vmem:[%s3725_s1 + $0xe] sm:$0x3] }
  0xc0   :  { %992 = vmatpush1.bf16.msra.mxu1 %v931_v14  ;;  %v3952_v45 = vsel %vm3339_vm13, 4294967295, %v3951_v45  ;;  %1009 = vmatprep.mubr.bf16.mxu1 %v3764_v3  ;;  %3959 = vst [vmem:[#allocation22_spill] sm:$0xff] %v3958_v33  ;;  %v1165_v50 = vsel %vm3960_vm12, %v2645_v23, %v2646_v15  ;;  %vm3961_vm11 = vmmov %vm3960_vm12  ;;  %v1176_v57 = vsel %vm3339_vm13, %v1164_v46, 0.0 }
  0xc1   :  { %3953 = vst [vmem:[#allocation21_spill] sm:$0xff] %v3952_v45  ;;  %2544 = vmatprep.subr.msk.bf16.mxu1 %vm3955_vm14, %v1052_v40  ;;  %v1163_v56 = vsel %vm3961_vm11, %v1159_v34, %v1161_v17  ;;  %vm3962_vm14 = vcmp.lt.s32.totalorder %v2881_v37, 16  ;;  %vm3966_vm12 = vmmov %vm3954_vm6  ;;  %v1182_v8 = vpack.c.bf16 %v1176_v57, %v1176_v57  ;;  %vm3967_vm11 = vcmask 31744  }
  0xc2   :  { %vm3367_vm7 = vmand %vm3251_vm5, %vm3962_vm14  ;;  %v1063_v61 = vsel %vm3966_vm12, %v1051_v18, 0  ;;  %v1177_v4 = vsel %vm3351_vm3, %v1163_v56, 0.0 }
  0xc3   :  { %v3964_v44 = vsel %vm3367_vm7, 4294967295, %v3963_v44  ;;  %v1175_v37 = vsel %vm3367_vm7, %v1165_v50, 0.0  ;;  %vm3968_vm14 = vmmov %vm3967_vm11  ;;  %v1183_v10 = vpack.c.bf16 %v1177_v4, %v1177_v4 }
  0xc4   :  { %3965 = vst [vmem:[#allocation23_spill] sm:$0xff] %v3964_v44  ;;  %v1181_v12 = vpack.c.bf16 %v1175_v37, %v1175_v37  ;;  %vm3969_vm12 = vmmov %vm3954_vm6 }
  0xc5   :  { %2538 = vmatmul.mubr.msk.bf16.vlgmr.msra.gmra.mxu0 %vm3967_vm11, %v2536_v59  ;;  %vm3970_vm3 = vmmov %vm3954_vm6 }
  0xc6   :  { %1083 = vmatpush1.bf16.msra.mxu0 %v1057_v54  ;;  %1100 = vmatprep.mubr.bf16.mxu0 %v3764_v3  ;;  %v1189_v15 = vsel %vm3970_vm3, %v1181_v12, 0  ;;  %vm3971_vm11 = vmmov %vm3970_vm3  ;;  %vm3785_vm3 = vcmask 1043456  }
  0xc7   :  { %2540 = vmatmul.mubr.msk.bf16.vlgmr.msra.gmra.mxu1 %vm3968_vm14, %v2536_v59  ;;  %2547 = vmatprep.subr.msk.bf16.mxu0 %vm3954_vm6, %v1182_v8  ;;  %v1195_v23 = vsel %vm3971_vm11, %v1183_v10, 0  ;;  %vm3972_vm0 = vmmov %vm3968_vm14 }
  0xc8   :  { %1124 = vmatpush1.bf16.msra.mxu1 %v1063_v61  ;;  %1141 = vmatprep.mubr.bf16.mxu1 %v3764_v3  ;;  %vm3973_vm6 = vmmov %vm3972_vm0 }
  0xc9   :  { %2549 = vmatprep.subr.msk.bf16.mxu1 %vm3969_vm12, %v1184_v53  ;;  %vm3974_vm12 = vmmov %vm3972_vm0 }
  0xcd   :  { %2543 = vmatmul.mubr.msk.bf16.vlgmr.msra.gmra.mxu0 %vm3968_vm14, %v2541_v19  ;;  %vm3977_vm14 = vcmask 1041408  }
  0xce   :  { %1215 = vmatpush1.bf16.msra.mxu0 %v1189_v15  ;;  %1232 = vmatprep.mubr.bf16.mxu0 %v3764_v3 }
  0xcf   :  { %2545 = vmatmul.mubr.msk.bf16.vlgmr.msra.gmra.mxu1 %vm3972_vm0, %v2541_v19  ;;  %vm3975_vm0 = vcmp.lt.s32.totalorder %v2835_v7, 16 }
  0xd0   :  { %1256 = vmatpush1.bf16.msra.mxu1 %v1195_v23  ;;  %1273 = vmatprep.mubr.bf16.mxu1 %v3764_v3  ;;  %vm3976_vm11 = vmmov %vm3975_vm0 }
  0xd5   :  { %2548 = vmatmul.mubr.msk.bf16.vlgmr.msra.gmra.mxu0 %vm3973_vm6, %v2546_v21  ;;  %vm3978_vm6 = vmmov %vm3975_vm0 }
  0xd6   :  { %1432 = vmatprep.mubr.bf16.mxu0 %v3764_v3 }
  0xd7   :  { %2550 = vmatmul.mubr.msk.bf16.vlgmr.msra.gmra.mxu1 %vm3974_vm12, %v2546_v21  ;;  %vm3979_vm12 = vmmov %vm3975_vm0 }
  0xd8   :  { %1473 = vmatprep.mubr.bf16.mxu1 %v3764_v3 }
 0x147   :  { %v202_v14 = vpop.f32.mrf.mxu0 }
 0x149   :  { %v204_v34 = vpop.f32.mrf.mxu0 }
 0x14b   :  { %v243_v17 = vpop.f32.mrf.mxu1  ;;  %v206_v22 = vpop.f32.mrf.mxu0 }
 0x14d   :  { %v245_v35 = vpop.f32.mrf.mxu1  ;;  %v207_v6 = vpop.f32.mrf.mxu0 }
 0x14f   :  { %v247_v40 = vpop.f32.mrf.mxu1 }
 0x151   :  { %v248_v47 = vpop.f32.mrf.mxu1 }
 0x156   :  { %v299_v46 = vpop.f32.mrf.mxu0 }
 0x157   :  { %v300_v58 = vadd.f32 %v299_v46, %v202_v14 }
 0x158   :  { %v340_v18 = vpop.f32.mrf.mxu1  ;;  %v301_v27 = vpop.f32.mrf.mxu0 }
 0x159   :  { %v341_v20 = vadd.f32 %v340_v18, %v243_v17 }
 0x15a   :  { %v342_v50 = vpop.f32.mrf.mxu1  ;;  %v303_v51 = vpop.f32.mrf.mxu0 }
 0x15c   :  { %v344_v56 = vpop.f32.mrf.mxu1  ;;  %v304_v57 = vpop.f32.mrf.mxu0 }
 0x15e   :  { %v345_v59 = vpop.f32.mrf.mxu1  ;;  %v439_v54 = vpop.f32.mrf.mxu0 }
 0x160   :  { %v480_v61 = vpop.f32.mrf.mxu1  ;;  %v441_v53 = vpop.f32.mrf.mxu0 }
 0x162   :  { %v482_v4 = vpop.f32.mrf.mxu1  ;;  %v443_v8 = vpop.f32.mrf.mxu0 }
 0x164   :  { %v484_v37 = vpop.f32.mrf.mxu1  ;;  %v444_v10 = vpop.f32.mrf.mxu0 }
 0x166   :  { %v485_v12 = vpop.f32.mrf.mxu1 }
 0x16c   :  { %v583_v19 = vpop.f32.mrf.mxu0 }
 0x16e   :  { %v624_v15 = vpop.f32.mrf.mxu1  ;;  %v585_v23 = vpop.f32.mrf.mxu0 }
 0x170   :  { %v626_v21 = vpop.f32.mrf.mxu1  ;;  %v587_v22 = vpop.f32.mrf.mxu0 }
 0x172   :  { %v628_v40 = vpop.f32.mrf.mxu1  ;;  %v588_v6 = vpop.f32.mrf.mxu0 }
 0x174   :  { %v629_v47 = vpop.f32.mrf.mxu1 }
 0x175   :  { %v690_v51 = vpop.f32.mrf.mxu0 }
 0x177   :  { %v731_v56 = vpop.f32.mrf.mxu1  ;;  %v692_v57 = vpop.f32.mrf.mxu0 }
 0x179   :  { %v733_v59 = vpop.f32.mrf.mxu1  ;;  %v694_v3 = vpop.f32.mrf.mxu0 }
 0x17a   :  { %v302_v3 = vadd.f32 %v301_v27, %v204_v34 }
 0x17b   :  { %v735_v5 = vpop.f32.mrf.mxu1  ;;  %v695_v2 = vpop.f32.mrf.mxu0 }
 0x17c   :  { %v487_v5 = vadd.f32 %v439_v54, %v300_v58  ;;  %v489_v2 = vadd.f32 %v480_v61, %v341_v20  ;;  %v488_v48 = vadd.f32 %v441_v53, %v302_v3 }
 0x17d   :  { %v736_v33 = vpop.f32.mrf.mxu1  ;;  %v822_v8 = vpop.f32.mrf.mxu0 }
 0x17e   :  { %v343_v33 = vadd.f32 %v342_v50, %v245_v35  ;;  %v631_v11 = vadd.f32 %v583_v19, %v487_v5  ;;  %v632_v29 = vadd.f32 %v585_v23, %v488_v48 }
 0x17f   :  { %v863_v37 = vpop.f32.mrf.mxu1  ;;  %v824_v10 = vpop.f32.mrf.mxu0 }
 0x180   :  { %v738_v0 = vadd.f32 %v690_v51, %v631_v11 }
 0x181   :  { %v865_v12 = vpop.f32.mrf.mxu1  ;;  %v826_v1 = vpop.f32.mrf.mxu0 }
 0x182   :  { %v633_v1 = vadd.f32 %v624_v15, %v489_v2 }
 0x183   :  { %v867_v44 = vpop.f32.mrf.mxu1  ;;  %v827_v31 = vpop.f32.mrf.mxu0 }
 0x184   :  { %v490_v44 = vadd.f32 %v482_v4, %v343_v33  ;;  %v740_v28 = vadd.f32 %v731_v56, %v633_v1 }
 0x185   :  { %v868_v45 = vpop.f32.mrf.mxu1  ;;  %v970_v22 = vpop.f32.mrf.mxu0 }
 0x186   :  { %v634_v39 = vadd.f32 %v626_v21, %v490_v44  ;;  %v872_v34 = vadd.f32 %v863_v37, %v740_v28 }
 0x187   :  { %v1011_v40 = vpop.f32.mrf.mxu1  ;;  %v972_v6 = vpop.f32.mrf.mxu0 }
 0x188   :  { %v741_v58 = vadd.f32 %v733_v59, %v634_v39  ;;  %v1020_v46 = vadd.f32 %v1011_v40, %v872_v34 }
 0x189   :  { %v1013_v47 = vpop.f32.mrf.mxu1  ;;  %v974_v25 = vpop.f32.mrf.mxu0 }
 0x18a   :  { %v739_v25 = vadd.f32 %v692_v57, %v632_v29  ;;  %v873_v18 = vadd.f32 %v865_v12, %v741_v58 }
 0x18b   :  { %v1015_v60 = vpop.f32.mrf.mxu1  ;;  %v975_v62 = vpop.f32.mrf.mxu0 }
 0x18c   :  { %v870_v60 = vadd.f32 %v822_v8, %v738_v0  ;;  %v871_v62 = vadd.f32 %v824_v10, %v739_v25  ;;  %v1021_v11 = vadd.f32 %v1013_v47, %v873_v18 }
 0x18d   :  { %v1016_v30 = vpop.f32.mrf.mxu1  ;;  %v1102_v31 = vpop.f32.mrf.mxu0 }
 0x18e   :  { %v1018_v30 = vadd.f32 %v970_v22, %v870_v60  ;;  %v1019_v54 = vadd.f32 %v972_v6, %v871_v62 }
 0x18f   :  { %v1143_v45 = vpop.f32.mrf.mxu1  ;;  %v1104_v14 = vpop.f32.mrf.mxu0 }
 0x190   :  { %v1150_v61 = vadd.f32 %v1102_v31, %v1018_v30  ;;  %v1152_v48 = vadd.f32 %v1143_v45, %v1020_v46  ;;  %v1151_v19 = vadd.f32 %v1104_v14, %v1019_v54  ;;  %v1313_v30 = vld [vmem:[%s3726_s2] sm:$0xf] }
 0x191   :  { %v1145_v17 = vpop.f32.mrf.mxu1  ;;  %v1106_v20 = vpop.f32.mrf.mxu0 }
 0x192   :  { %v1153_v0 = vadd.f32 %v1145_v17, %v1021_v11 }
 0x193   :  { %v1147_v35 = vpop.f32.mrf.mxu1  ;;  %v1107_v27 = vpop.f32.mrf.mxu0 }
 0x194   :  { %v1326_v27 = vld [vmem:[%s3727_s3] sm:$0xf] }
 0x195   :  { %v1148_v50 = vpop.f32.mrf.mxu1  ;;  %v1234_v53 = vpop.f32.mrf.mxu0 }
 0x196   :  { %v1282_v15 = vadd.f32 %v1234_v53, %v1150_v61 }
 0x197   :  { %v1275_v4 = vpop.f32.mrf.mxu1  ;;  %v1236_v39 = vpop.f32.mrf.mxu0 }
 0x198   :  { %v1284_v29 = vadd.f32 %v1275_v4, %v1152_v48  ;;  %v1297_v23 = vmul.f32 %v1282_v15, %v1282_v15  ;;  %v1283_v21 = vadd.f32 %v1236_v39, %v1151_v19  ;;  %v1287_v59 = vsel %vm3785_vm3, %v1282_v15, 0.0 }
 0x199   :  { %v1277_v28 = vpop.f32.mrf.mxu1  ;;  %v1238_v56 = vpop.f32.mrf.mxu0 }
 0x19a   :  { %v1285_v51 = vadd.f32 %v1277_v28, %v1153_v0  ;;  %v1299_v8 = vmul.f32 %v1284_v29, %v1284_v29  ;;  %v1288_v37 = vsel %vm3785_vm3, %v1283_v21, 0.0  ;;  %v1298_v10 = vmul.f32 %v1283_v21, %v1283_v21 }
 0x19b   :  { %v1279_v57 = vpop.f32.mrf.mxu1  ;;  %v1239_v12 = vpop.f32.mrf.mxu0  ;;  %v1289_v40 = vadd.f32 %v1288_v37, %v1287_v59  ;;  %v1290_v6 = vsel %vm3785_vm3, %v1284_v29, 0.0  ;;  %v1301_v3 = vsel %vm3785_vm3, %v1297_v23, 0.0 }
 0x19c   :  { %v1300_v47 = vmul.f32 %v1285_v51, %v1285_v51  ;;  %v1302_v5 = vsel %vm3785_vm3, %v1298_v10, 0.0  ;;  %v1292_v1 = vsel %vm3785_vm3, %v1285_v51, 0.0  ;;  %v1304_v44 = vsel %vm3785_vm3, %v1299_v8, 0.0 }
 0x19d   :  { %v1280_v22 = vpop.f32.mrf.mxu1  ;;  %v1291_v2 = vadd.f32 %v1290_v6, %v1289_v40  ;;  %v1303_v33 = vadd.f32 %v1302_v5, %v1301_v3 }
 0x19e   :  { %v1306_v14 = vsel %vm3785_vm3, %v1300_v47, 0.0 }
 0x19f   :  { %v1293_v31 = vadd.f32 %v1292_v1, %v1291_v2  ;;  %v1305_v45 = vadd.f32 %v1304_v44, %v1303_v33  ;;  %v2551_v44 = vld [vmem:[%s3728_s4 + $0x2] sm:$0x3] }
 0x1a1   :  { %1294 = vadd.xlane.f32.xlu0 %v1293_v31  ;;  %v1307_v17 = vadd.f32 %v1306_v14, %v1305_v45 }
 0x1a3   :  { %1308 = vadd.xlane.f32.xlu1 %v1307_v17 }
 0x22a   :  { %v1295_v25 = vpop.xlane.xlu0 %1294 }
 0x22b   :  { %v1296_v60 = vmul.f32 0.001953125, %v1295_v25 }
 0x22c   :  { %v1309_v34 = vpop.xlane.xlu1 %1308 }
 0x22d   :  { %v1311_v58 = vmul.f32 %v1296_v60, %v1296_v60  ;;  %v1310_v20 = vmul.f32 0.001953125, %v1309_v34 }
 0x22f   :  { %v1312_v35 = vsub.f32 %v1310_v20, %v1311_v58 }
 0x231   :  { %v1314_v62 = vadd.f32 1e-05, %v1312_v35 }
 0x233   :  { %2691 = vrsqrt.f32 %v1314_v62 }
 0x240   :  { %v2692_v46 = vpop.eup %2691 }
 0x241   :  { %v1316_v18 = vmul.f32 %v2692_v46, %v1313_v30 }
 0x243   :  { %1319 = vperm.xlu0 %2647, %v1316_v18   ;;  %v1327_v50 = vmul.f32 %v1316_v18, %v1296_v60 }
 0x245   :  { %v1328_v54 = vsub.f32 %v1326_v27, %v1327_v50 }
 0x247   :  { %1331 = vperm.xlu1 %2648, %v1328_v54  }
 0x2be   :  { %v1320_v61 = vpop.permute.xlu0 %1319 }
 0x2bf   :  { %v1322_v48 = vmul.f32 %v1320_v61, %v1282_v15  ;;  %v1323_v11 = vmul.f32 %v1320_v61, %v1283_v21  ;;  %v1324_v0 = vmul.f32 %v1320_v61, %v1284_v29  ;;  %v1325_v39 = vmul.f32 %v1320_v61, %v1285_v51 }
 0x2c2   :  { %v1332_v53 = vpop.permute.xlu1 %1331 }
 0x2c3   :  { %v1334_v4 = vadd.f32 %v1332_v53, %v1322_v48  ;;  %v1335_v19 = vadd.f32 %v1332_v53, %v1323_v11  ;;  %v1336_v56 = vadd.f32 %v1332_v53, %v1324_v0  ;;  %v1337_v57 = vadd.f32 %v1332_v53, %v1325_v39  ;;  %v1358_v0 = vld [vmem:[%s3728_s4] sm:$0x3] }
 0x2c5   :  { %v3416_v28 = vmax.f32 %v1334_v4, 0.0  ;;  %v3418_v23 = vmax.f32 %v1335_v19, 0.0  ;;  %v3424_v15 = vmax.f32 %v1336_v56, 0.0  ;;  %v3426_v21 = vmax.f32 %v1337_v57, 0.0 }
 0x2c7   :  { %v2659_v59 = vpack.i.bf16 %v3418_v23, %v3416_v28 }
 0x2c9   :  { %2660 = vrot.lane.b32.xlu0 %v2659_v59, %s2722_s30  ;;  %2650 = vrot.lane.b32.xlu1 %v2659_v59, %s2719_s28 }
 0x2cd   :  { %1583 = vrot.lane.b32.xlu0 %v3424_v15, %s2722_s30  ;;  %1369 = vrot.lane.b32.xlu1 %v3426_v21, %s2719_s28 }
 0x2d1   :  { %1708 = vrot.lane.b32.xlu0 %v3426_v21, %s2723_s8  ;;  %1367 = vrot.lane.b32.xlu1 %v3424_v15, %s2719_s28 }
 0x2d5   :  { %2670 = vrot.lane.b32.xlu0 %v2659_v59, %s2724_s9  ;;  %2655 = vrot.lane.b32.xlu1 %v2659_v59, %s2721_s29 }
 0x2d9   :  { %1938 = vrot.lane.b32.xlu0 %v3426_v21, %s2724_s9  ;;  %1348 = vrot.lane.b32.xlu1 %v3426_v21, %s2721_s29 }
 0x2dd   :  { %2059 = vrot.lane.b32.xlu0 %v3424_v15, %s2725_s10  ;;  %1346 = vrot.lane.b32.xlu1 %v3424_v15, %s2721_s29 }
 0x2e1   :  { %2680 = vrot.lane.b32.xlu0 %v2659_v59, %s2726_s11  ;;  %1585 = vrot.lane.b32.xlu1 %v3426_v21, %s2722_s30 }
 0x2e5   :  { %2184 = vrot.lane.b32.xlu0 %v3426_v21, %s2726_s11  ;;  %2665 = vrot.lane.b32.xlu1 %v2659_v59, %s2723_s8 }
 0x2e9   :  { %2305 = vrot.lane.b32.xlu0 %v3424_v15, %s2727_s12  ;;  %1706 = vrot.lane.b32.xlu1 %v3424_v15, %s2723_s8 }
 0x2ed   :  { %1936 = vrot.lane.b32.xlu1 %v3424_v15, %s2724_s9 }
 0x2f1   :  { %2675 = vrot.lane.b32.xlu1 %v2659_v59, %s2725_s10 }
 0x2f5   :  { %2061 = vrot.lane.b32.xlu1 %v3426_v21, %s2725_s10 }
 0x2f9   :  { %2182 = vrot.lane.b32.xlu1 %v3424_v15, %s2726_s11 }
 0x2fd   :  { %2685 = vrot.lane.b32.xlu1 %v2659_v59, %s2727_s12 }
 0x301   :  { %2307 = vrot.lane.b32.xlu1 %v3426_v21, %s2727_s12 }
 0x33b   :  { %v2651_v29 = vpop.permute.xlu1 %2650  ;;  %v2661_v3 = vpop.permute.xlu0 %2660 }
 0x33c   :  { %v2653_v51 = vunpack.i.h.bf16 %v2651_v29  ;;  %v2652_v8 = vunpack.i.l.bf16 %v2651_v29  ;;  %v2663_v31 = vunpack.i.h.bf16 %v2661_v3  ;;  %v2662_v45 = vunpack.i.l.bf16 %v2661_v3 }
 0x33e   :  { %v1373_v37 = vsel %vm3975_vm0, %v2652_v8, %v2653_v51  ;;  %vm3981_vm0 = vnez %v3793_v42 }
 0x33f   :  { %v1376_v10 = vsel %vm2865_vm8, %v1373_v37, 0.0  ;;  %v1370_v12 = vpop.permute.xlu1 %1369  ;;  %vm3980_vm8 = vmmov %vm3977_vm14  ;;  %v1584_v35 = vpop.permute.xlu0 %1583 }
 0x340   :  { %v1374_v22 = vsel %vm3976_vm11, %v1370_v12, %v2652_v8  ;;  %v1382_v40 = vpack.c.bf16 %v1376_v10, %v1376_v10  ;;  %vm3982_vm11 = vnez %v3797_v49  ;;  %v3986_v49 = vmov 0  }
 0x341   :  { %v1375_v6 = vsel %vm2891_vm1, %v1374_v22, 0.0  ;;  %vm3983_vm1 = vmmov %vm3980_vm8 }
 0x342   :  { %v1381_v47 = vpack.c.bf16 %v1375_v6, %v1375_v6  ;;  %2552 = vmatprep.subr.msk.bf16.mxu0 %vm3977_vm14, %v1382_v40  ;;  %vm3984_vm14 = vcmask 31744  }
 0x343   :  { %v1368_v5 = vpop.permute.xlu1 %1367  ;;  %v1709_v53 = vpop.permute.xlu0 %1708 }
 0x344   :  { %v1371_v2 = vsel %vm3978_vm6, %v1368_v5, %v1370_v12  ;;  %v1372_v32 = vsel %vm3979_vm12, %v2653_v51, %v1368_v5  ;;  %v1389_v33 = vsel %vm3980_vm8, %v1381_v47, 0  ;;  %vm3985_vm6 = vmmov %vm3983_vm1  ;;  %vm3987_vm12 = vcmp.lt.s32.totalorder %v2835_v7, 15 }
 0x345   :  { %v1377_v1 = vsel %vm3981_vm0, %v1372_v32, 0.0  ;;  %v1378_v43 = vsel %vm3982_vm11, %v1371_v2, 0.0  ;;  %1415 = vmatpush1.bf16.msra.mxu0 %v1389_v33  ;;  %v1589_v58 = vsel %vm3987_vm12, %v2662_v45, %v2663_v31  ;;  %vm3988_vm8 = vcmp.lt.s32.totalorder %v2835_v7, 17 }
 0x346   :  { %v1383_v14 = vpack.c.bf16 %v1377_v1, %v1377_v1  ;;  %v1384_v17 = vpack.c.bf16 %v1378_v43, %v1378_v43  ;;  %vm3989_vm0 = vnez %v3791_v36  ;;  %vm3990_vm11 = vmmov %vm3988_vm8  ;;  %vm3994_vm12 = vcmask 1041408  }
 0x347   :  { %v2656_v25 = vpop.permute.xlu1 %2655  ;;  %v2671_v12 = vpop.permute.xlu0 %2670 }
 0x348   :  { %v2658_v60 = vunpack.i.h.bf16 %v2656_v25  ;;  %v2657_v34 = vunpack.i.l.bf16 %v2656_v25  ;;  %2554 = vmatprep.subr.msk.bf16.mxu1 %vm3983_vm1, %v1384_v17  ;;  %2553 = vmatmul.mubr.msk.bf16.vlgmr.msra.gmra.mxu0 %vm3984_vm14, %v2551_v44  ;;  %v1395_v42 = vsel %vm3985_vm6, %v1383_v14, 0  ;;  %vm3991_vm1 = vnez %v3807_v13  ;;  %v4021_v17 = vld [vmem:[#allocation7_spill] sm:$0xff] }
 0x349   :  { %1529 = vmatprep.mubr.bf16.mxu0 %v3986_v49  ;;  %1456 = vmatpush1.bf16.msra.mxu1 %v1395_v42  ;;  %v1592_v27 = vsel %vm3991_vm1, %v1589_v58, 0.0  ;;  %vm3992_vm14 = vnez %v3802_v63  ;;  %vm3993_vm6 = vcmask 31744   ;;  %vm3998_vm1 = vmmov %vm3994_vm12 }
 0x34a   :  { %v1352_v20 = vsel %vm3988_vm8, %v2657_v34, %v2658_v60  ;;  %vm3995_vm8 = vcmp.lt.s32.totalorder %v2835_v7, 15  ;;  %v1598_v11 = vpack.c.bf16 %v1592_v27, %v1592_v27 }
 0x34b   :  { %v1355_v62 = vsel %vm3989_vm0, %v1352_v20, 0.0  ;;  %v1349_v30 = vpop.permute.xlu1 %1348  ;;  %v1588_v36 = vsel %vm3995_vm8, %v2663_v31, %v1584_v35  ;;  %vm3996_vm0 = vmmov %vm3990_vm11  ;;  %v1939_v14 = vpop.permute.xlu0 %1938 }
 0x34c   :  { %v1353_v46 = vsel %vm3990_vm11, %v1349_v30, %v2657_v34  ;;  %v1360_v18 = vpack.c.bf16 %v1355_v62, %v1355_v62  ;;  %2555 = vmatmul.mubr.msk.bf16.vlgmr.msra.gmra.mxu1 %vm3993_vm6, %v2551_v44  ;;  %vm3997_vm11 = vmmov %vm3996_vm0  ;;  %vm4000_vm6 = vnez %v3805_v9  ;;  %v4069_v62 = vld [vmem:[#allocation11_spill] sm:$0xff] }
 0x34d   :  { %v1354_v50 = vsel %vm3992_vm14, %v1353_v46, 0.0  ;;  %1570 = vmatprep.mubr.bf16.mxu1 %v3986_v49  ;;  %vm3999_vm14 = vnez %v3799_v55  ;;  %vm4002_vm8 = vmmov %vm3998_vm1  ;;  %v1830_v46 = vpack.c.bf16 %v3426_v21, %v3426_v21 }
 0x34e   :  { %v1359_v54 = vpack.c.bf16 %v1354_v50, %v1354_v50  ;;  %2556 = vmatprep.subr.msk.bf16.mxu0 %vm3994_vm12, %v1360_v18  ;;  %vm4001_vm12 = vnez %v3822_v38  ;;  %vm4009_vm3 = vmmov %vm4002_vm8  ;;  %v2565_v18 = vld [vmem:[%s3728_s4 + $0x6] sm:$0x3] }
 0x34f   :  { %v1347_v61 = vpop.permute.xlu1 %1346  ;;  %v1593_v39 = vsel %vm4001_vm12, %v1588_v36, 0.0  ;;  %vm4008_vm12 = vnez %v3826_v41  ;;  %v2560_v41 = vld [vmem:[%s3728_s4 + $0x4] sm:$0x3] }
 0x350   :  { %v1350_v48 = vsel %vm3996_vm0, %v1347_v61, %v1349_v30  ;;  %v1351_v13 = vsel %vm3997_vm11, %v2658_v60, %v1347_v61  ;;  %v1486_v63 = vsel %vm3998_vm1, %v1359_v54, 0  ;;  %vm4003_vm0 = vcmp.lt.s32.totalorder %v2835_v7, 15  ;;  %v2060_v54 = vpop.permute.xlu0 %2059 }
 0x351   :  { %v1356_v4 = vsel %vm3999_vm14, %v1351_v13, 0.0  ;;  %v1357_v19 = vsel %vm4000_vm6, %v1350_v48, 0.0  ;;  %1512 = vmatpush1.bf16.msra.mxu0 %v1486_v63  ;;  %vm4004_vm11 = vmmov %vm4003_vm0  ;;  %vm4005_vm1 = vcmask 31744   ;;  %v1599_v29 = vpack.c.bf16 %v1593_v39, %v1593_v39 }
 0x352   :  { %v1361_v56 = vpack.c.bf16 %v1356_v4, %v1356_v4  ;;  %v1362_v57 = vpack.c.bf16 %v1357_v19, %v1357_v19  ;;  %2561 = vmatprep.subr.msk.bf16.mxu0 %vm4002_vm8, %v1598_v11  ;;  %vm4006_vm14 = vmmov %vm4002_vm8  ;;  %vm4007_vm6 = vnez %v3815_v24  ;;  %v2672_v60 = vunpack.i.l.bf16 %v2671_v12  ;;  %v4037_v11 = vld [vmem:[#allocation9_spill] sm:$0xff] }
 0x353   :  { %v1586_v59 = vpop.permute.xlu1 %1585  ;;  %vm4010_vm8 = vmmov %vm4009_vm3  ;;  %v1829_v48 = vpack.c.bf16 %v3424_v15, %v3424_v15 }
 0x354   :  { %v1587_v55 = vsel %vm4003_vm0, %v1584_v35, %v1586_v59  ;;  %v1590_v9 = vsel %vm4004_vm11, %v1586_v59, %v2662_v45  ;;  %2557 = vmatmul.mubr.msk.bf16.vlgmr.msra.gmra.mxu0 %vm4005_vm1, %v1358_v0  ;;  %2558 = vmatprep.subr.msk.bf16.mxu1 %vm4006_vm14, %v1362_v57  ;;  %v1492_v8 = vsel %vm4009_vm3, %v1361_v56, 0  ;;  %vm4011_vm0 = vmmov %vm4009_vm3  ;;  %vm4014_vm3 = vcmp.lt.s32.totalorder %v2835_v7, 1  ;;  %v2681_v57 = vpop.permute.xlu0 %2680 }
 0x355   :  { %v1591_v38 = vsel %vm4007_vm6, %v1590_v9, 0.0  ;;  %v1594_v51 = vsel %vm4008_vm12, %v1587_v55, 0.0  ;;  %1648 = vmatprep.mubr.bf16.mxu0 %v3986_v49  ;;  %1553 = vmatpush1.bf16.msra.mxu1 %v1492_v8  ;;  %vm4012_vm11 = vmmov %vm4005_vm1  ;;  %vm4016_vm6 = vnez %v3832_v52  ;;  %vm4017_vm12 = vnez %v3855_v26 }
 0x356   :  { %v1597_v37 = vpack.c.bf16 %v1591_v38, %v1591_v38  ;;  %v1600_v10 = vpack.c.bf16 %v1594_v51, %v1594_v51  ;;  %vm4013_vm1 = vmmov %vm4011_vm0  ;;  %v2673_v45 = vunpack.i.h.bf16 %v2671_v12  ;;  %v1828_v26 = vpack.c.bf16 %v3418_v23, %v3418_v23  ;;  %v4044_v38 = vld [vmem:[#allocation12_spill] sm:$0xff] }
 0x357   :  { %v2666_v22 = vpop.permute.xlu1 %2665  ;;  %v1611_v24 = vsel %vm4013_vm1, %v1599_v29, 0  ;;  %vm4015_vm14 = vmmov %vm4014_vm3  ;;  %vm4020_vm1 = vnez %v3851_v16  ;;  %v1827_v35 = vpack.c.bf16 %v3416_v28, %v3416_v28  ;;  %v2570_v29 = vld [vmem:[%s3728_s4 + $0x8] sm:$0x3]  ;;  %v2683_v12 = vunpack.i.h.bf16 %v2681_v57 }
 0x358   :  { %v2668_v40 = vunpack.i.h.bf16 %v2666_v22  ;;  %v2667_v6 = vunpack.i.l.bf16 %v2666_v22  ;;  %2563 = vmatprep.subr.msk.bf16.mxu1 %vm4010_vm8, %v1600_v10  ;;  %v1605_v47 = vsel %vm4011_vm0, %v1597_v37, 0  ;;  %2559 = vmatmul.mubr.msk.bf16.vlgmr.msra.gmra.mxu1 %vm4012_vm11, %v1358_v0  ;;  %vm4018_vm8 = vmmov %vm4014_vm3 }
 0x359   :  { %1631 = vmatpush1.bf16.msra.mxu0 %v1605_v47  ;;  %1672 = vmatpush1.bf16.msra.mxu1 %v1611_v24  ;;  %vm4019_vm0 = vmmov %vm4014_vm3 }
 0x35a   :  { %v1712_v3 = vsel %vm4014_vm3, %v2667_v6, %v2668_v40  ;;  %v1713_v5 = vsel %vm4015_vm14, %v1709_v53, %v2667_v6  ;;  %1689 = vmatprep.mubr.bf16.mxu1 %v3986_v49  ;;  %vm4022_vm3 = vnez %v4021_v17  ;;  %vm4023_vm14 = vcmask 1041408  }
 0x35b   :  { %v1715_v2 = vsel %vm4016_vm6, %v1712_v3, 0.0  ;;  %v1707_v32 = vpop.permute.xlu1 %1706  ;;  %v1714_v33 = vsel %vm4017_vm12, %v1713_v5, 0.0  ;;  %vm4024_vm6 = vmmov %vm4023_vm14  ;;  %vm4025_vm12 = vcmp.lt.s32.totalorder %v2835_v7, 127  ;;  %v4052_v3 = vld [vmem:[#allocation14_spill] sm:$0xff] }
 0x35c   :  { %v1710_v1 = vsel %vm4018_vm8, %v1707_v32, %v1709_v53  ;;  %v1711_v43 = vsel %vm4019_vm0, %v2668_v40, %v1707_v32  ;;  %2562 = vmatmul.mubr.msk.bf16.vlgmr.msra.gmra.mxu0 %vm4012_vm11, %v2560_v41  ;;  %v1721_v44 = vpack.c.bf16 %v1715_v2, %v1715_v2  ;;  %v1720_v31 = vpack.c.bf16 %v1714_v33, %v1714_v33  ;;  %vm4026_vm8 = vmmov %vm4024_vm6  ;;  %v2185_v32 = vpop.permute.xlu0 %2184 }
 0x35d   :  { %v1716_v52 = vsel %vm4020_vm1, %v1711_v43, 0.0  ;;  %v1717_v25 = vsel %vm4022_vm3, %v1710_v1, 0.0  ;;  %1771 = vmatprep.mubr.bf16.mxu0 %v3986_v49  ;;  %vm4027_vm0 = vmmov %vm4024_vm6  ;;  %vm4030_vm1 = vcmask 31744  }
 0x35e   :  { %v1722_v34 = vpack.c.bf16 %v1716_v52, %v1716_v52  ;;  %v1723_v42 = vpack.c.bf16 %v1717_v25, %v1717_v25  ;;  %2566 = vmatprep.subr.msk.bf16.mxu0 %vm4023_vm14, %v1721_v44  ;;  %v1728_v58 = vsel %vm4024_vm6, %v1720_v31, 0  ;;  %vm4028_vm11 = vmmov %vm4027_vm0  ;;  %v4057_v31 = vld [vmem:[#allocation13_spill] sm:$0xff]  ;;  %v2575_v52 = vld [vmem:[%s3728_s4 + $0xa] sm:$0x3] }
 0x35f   :  { %v1937_v20 = vpop.permute.xlu1 %1936  ;;  %1754 = vmatpush1.bf16.msra.mxu0 %v1728_v58  ;;  %vm4031_vm3 = vmmov %vm4025_vm12  ;;  %v4062_v25 = vld [vmem:[#allocation18_spill] sm:$0xff] }
 0x360   :  { %v1941_v16 = vsel %vm4025_vm12, %v2673_v45, %v1937_v20  ;;  %2568 = vmatprep.subr.msk.bf16.mxu1 %vm4026_vm8, %v1723_v42  ;;  %2571 = vmatprep.subr.msk.bf16.mxu0 %vm4027_vm0, %v1828_v26  ;;  %v1734_v23 = vsel %vm4028_vm11, %v1722_v34, 0  ;;  %v1942_v27 = vsel %vm4031_vm3, %v2672_v60, %v2673_v45  ;;  %vm4032_vm14 = vmmov %vm4031_vm3  ;;  %vm4038_vm8 = vnez %v4037_v11 }
 0x361   :  { %v1945_v30 = vsel %vm3151_vm15, %v1941_v16, 0.0  ;;  %2564 = vmatmul.mubr.msk.bf16.vlgmr.msra.gmra.mxu1 %vm4030_vm1, %v2560_v41  ;;  %v1943_v28 = vsel %vm4032_vm14, %v1939_v14, %v2672_v60  ;;  %vm4033_vm15 = vmmov %vm4027_vm0  ;;  %v1944_v63 = vsel %vm3173_vm4, %v1942_v27, 0.0  ;;  %vm4045_vm14 = vnez %v4044_v38  ;;  %v2585_v38 = vld [vmem:[%s3728_s4 + $0xe] sm:$0x3] }
 0x362   :  { %v1951_v50 = vpack.c.bf16 %v1945_v30, %v1945_v30  ;;  %1795 = vmatpush1.bf16.msra.mxu1 %v1734_v23  ;;  %1812 = vmatprep.mubr.bf16.mxu1 %v3986_v49  ;;  %vm4034_vm6 = vmmov %vm4030_vm1  ;;  %v1947_v53 = vsel %vm4038_vm8, %v1943_v28, 0.0  ;;  %v1950_v56 = vpack.c.bf16 %v1944_v63, %v1944_v63  ;;  %v2682_v41 = vunpack.i.l.bf16 %v2681_v57 }
 0x363   :  { %2573 = vmatprep.subr.msk.bf16.mxu1 %vm4033_vm15, %v1830_v46  ;;  %v2676_v36 = vpop.permute.xlu1 %2675  ;;  %vm4035_vm12 = vmmov %vm4027_vm0  ;;  %vm4039_vm0 = vcmp.lt.s32.totalorder %v2835_v7, 113  ;;  %v1953_v15 = vpack.c.bf16 %v1947_v53, %v1947_v53 }
 0x364   :  { %v2678_v61 = vunpack.i.h.bf16 %v2676_v36  ;;  %2567 = vmatmul.mubr.msk.bf16.vlgmr.msra.gmra.mxu0 %vm4034_vm6, %v2565_v18  ;;  %v1835_v21 = vsel %vm4035_vm12, %v1827_v35, 0  ;;  %v2677_v19 = vunpack.i.l.bf16 %v2676_v36  ;;  %vm4040_vm1 = vmmov %vm4031_vm3 }
 0x365   :  { %1861 = vmatpush1.bf16.msra.mxu0 %v1835_v21  ;;  %1878 = vmatprep.mubr.bf16.mxu0 %v3986_v49  ;;  %v1940_v0 = vsel %vm4040_vm1, %v1937_v20, %v1939_v14  ;;  %vm4042_vm4 = vmmov %vm4034_vm6  ;;  %v2306_v20 = vpop.permute.xlu0 %2305 }
 0x366   :  { %v2064_v4 = vsel %vm4039_vm0, %v2678_v61, %v2060_v54  ;;  %2576 = vmatprep.subr.msk.bf16.mxu0 %vm4028_vm11, %v1951_v50  ;;  %vm4043_vm3 = vmmov %vm4028_vm11  ;;  %v1946_v51 = vsel %vm4045_vm14, %v1940_v0, 0.0  ;;  %vm4054_vm11 = vcmp.lt.s32.totalorder %v2835_v7, 112 }
 0x367   :  { %v2062_v39 = vpop.permute.xlu1 %2061  ;;  %v2068_v55 = vsel %vm3242_vm9, %v2064_v4, 0.0  ;;  %v1841_v9 = vsel %vm4043_vm3, %v1829_v48, 0  ;;  %vm4046_vm15 = vmmov %vm4039_vm0  ;;  %v1952_v6 = vpack.c.bf16 %v1946_v51, %v1946_v51  ;;  %v2580_v48 = vld [vmem:[%s3728_s4 + $0xc] sm:$0x3]  ;;  %v4090_v51 = vld [vmem:[#allocation22_spill] sm:$0xff] }
 0x368   :  { %v2065_v8 = vsel %vm4046_vm15, %v2677_v19, %v2678_v61  ;;  %vm4047_vm6 = vmmov %vm4039_vm0  ;;  %v2074_v40 = vpack.c.bf16 %v2068_v55, %v2068_v55  ;;  %vm4053_vm0 = vnez %v4052_v3 }
 0x369   :  { %2569 = vmatmul.mubr.msk.bf16.vlgmr.msra.gmra.mxu1 %vm4042_vm4, %v2565_v18  ;;  %v2066_v37 = vsel %vm4047_vm6, %v2062_v39, %v2677_v19  ;;  %vm4048_vm9 = vmmov %vm4043_vm3  ;;  %v2067_v24 = vsel %vm3279_vm10, %v2065_v8, 0.0 }
 0x36a   :  { %1902 = vmatpush1.bf16.msra.mxu1 %v1841_v9  ;;  %1919 = vmatprep.mubr.bf16.mxu1 %v3986_v49  ;;  %vm4049_vm12 = vmmov %vm4042_vm4  ;;  %v2070_v5 = vsel %vm4053_vm0, %v2066_v37, 0.0  ;;  %v2073_v43 = vpack.c.bf16 %v2067_v24, %v2067_v24 }
 0x36b   :  { %2578 = vmatprep.subr.msk.bf16.mxu1 %vm4048_vm9, %v1953_v15  ;;  %v2183_v10 = vpop.permute.xlu1 %2182  ;;  %vm4050_vm8 = vmmov %vm4043_vm3  ;;  %v2076_v44 = vpack.c.bf16 %v2070_v5, %v2070_v5  ;;  %v4084_v15 = vld [vmem:[#allocation20_spill] sm:$0xff] }
 0x36c   :  { %2572 = vmatmul.mubr.msk.bf16.vlgmr.msra.gmra.mxu0 %vm4049_vm12, %v2570_v29  ;;  %v1958_v22 = vsel %vm4050_vm8, %v1950_v56, 0  ;;  %v2187_v2 = vsel %vm4054_vm11, %v2683_v12, %v2183_v10  ;;  %vm4055_vm1 = vmmov %vm4043_vm3  ;;  %vm4058_vm3 = vnez %v4057_v31 }
 0x36d   :  { %1984 = vmatpush1.bf16.msra.mxu0 %v1958_v22  ;;  %2001 = vmatprep.mubr.bf16.mxu0 %v3986_v49  ;;  %vm4056_vm4 = vmmov %vm4047_vm6  ;;  %v2191_v45 = vsel %vm4058_vm3, %v2187_v2, 0.0  ;;  %vm4063_vm6 = vnez %v4062_v25 }
 0x36e   :  { %2581 = vmatprep.subr.msk.bf16.mxu0 %vm4055_vm1, %v2074_v40  ;;  %v2063_v33 = vsel %vm4056_vm4, %v2060_v54, %v2062_v39  ;;  %vm4059_vm10 = vmmov %vm4049_vm12  ;;  %v2197_v42 = vpack.c.bf16 %v2191_v45, %v2191_v45 }
 0x36f   :  { %v2686_v1 = vpop.permute.xlu1 %2685  ;;  %vm4060_vm14 = vmmov %vm4055_vm1  ;;  %v2069_v26 = vsel %vm4063_vm6, %v2063_v33, 0.0 }
 0x370   :  { %v1964_v14 = vsel %vm4060_vm14, %v1952_v6, 0  ;;  %vm4061_vm15 = vmmov %vm4054_vm11  ;;  %v2688_v60 = vunpack.i.h.bf16 %v2686_v1  ;;  %v2075_v16 = vpack.c.bf16 %v2069_v26, %v2069_v26  ;;  %v2687_v18 = vunpack.i.l.bf16 %v2686_v1 }
 0x371   :  { %2574 = vmatmul.mubr.msk.bf16.vlgmr.msra.gmra.mxu1 %vm4059_vm10, %v2570_v29  ;;  %v2188_v17 = vsel %vm4061_vm15, %v2682_v41, %v2683_v12  ;;  %vm4064_vm9 = vmmov %vm4054_vm11  ;;  %vm4070_vm11 = vnez %v4069_v62  ;;  %v2590_v12 = vld [vmem:[%s3728_s4 + $0x10] sm:$0x3] }
 0x372   :  { %2025 = vmatpush1.bf16.msra.mxu1 %v1964_v14  ;;  %2042 = vmatprep.mubr.bf16.mxu1 %v3986_v49  ;;  %v2189_v34 = vsel %vm4064_vm9, %v2185_v32, %v2682_v41  ;;  %vm4065_vm12 = vmmov %vm4055_vm1  ;;  %v2190_v35 = vsel %vm3251_vm5, %v2188_v17, 0.0 }
 0x373   :  { %2583 = vmatprep.subr.msk.bf16.mxu1 %vm4065_vm12, %v2076_v44  ;;  %vm4066_vm8 = vmmov %vm4059_vm10  ;;  %v2193_v30 = vsel %vm4070_vm11, %v2189_v34, 0.0  ;;  %v2308_v50 = vpop.permute.xlu1 %2307  ;;  %v2196_v28 = vpack.c.bf16 %v2190_v35, %v2190_v35 }
 0x374   :  { %2577 = vmatmul.mubr.msk.bf16.vlgmr.msra.gmra.mxu0 %vm4066_vm8, %v2575_v52  ;;  %vm4067_vm0 = vmmov %vm4055_vm1  ;;  %vm4071_vm1 = vcmp.lt.s32.totalorder %v2835_v7, 111  ;;  %v2199_v54 = vpack.c.bf16 %v2193_v30, %v2193_v30 }
 0x375   :  { %v2081_v58 = vsel %vm4067_vm0, %v2073_v43, 0  ;;  %2124 = vmatprep.mubr.bf16.mxu0 %v3986_v49  ;;  %v2310_v46 = vsel %vm4071_vm1, %v2688_v60, %v2306_v20  ;;  %vm4072_vm4 = vmmov %vm4067_vm0 }
 0x376   :  { %2107 = vmatpush1.bf16.msra.mxu0 %v2081_v58  ;;  %vm4073_vm3 = vmmov %vm4064_vm9  ;;  %v2314_v61 = vsel %vm3339_vm13, %v2310_v46, 0.0 }
 0x377   :  { %2586 = vmatprep.subr.msk.bf16.mxu0 %vm4072_vm4, %v2197_v42  ;;  %v2186_v27 = vsel %vm4073_vm3, %v2183_v10, %v2185_v32  ;;  %vm4075_vm10 = vmmov %vm4066_vm8  ;;  %v2320_v19 = vpack.c.bf16 %v2314_v61, %v2314_v61 }
 0x378   :  { %vm4076_vm5 = vmmov %vm4067_vm0  ;;  %v2192_v63 = vsel %vm3232_vm2, %v2186_v27, 0.0  ;;  %vm4085_vm2 = vnez %v4084_v15 }
 0x379   :  { %2579 = vmatmul.mubr.msk.bf16.vlgmr.msra.gmra.mxu1 %vm4075_vm10, %v2575_v52  ;;  %v2087_v21 = vsel %vm4076_vm5, %v2075_v16, 0  ;;  %vm4078_vm14 = vmmov %vm4071_vm1  ;;  %v2198_v0 = vpack.c.bf16 %v2192_v63, %v2192_v63 }
 0x37a   :  { %v2311_v11 = vsel %vm4078_vm14, %v2687_v18, %v2688_v60  ;;  %2148 = vmatpush1.bf16.msra.mxu1 %v2087_v21  ;;  %2165 = vmatprep.mubr.bf16.mxu1 %v3986_v49  ;;  %vm4079_vm15 = vmmov %vm4071_vm1 }
 0x37b   :  { %v2312_v53 = vsel %vm4079_vm15, %v2308_v50, %v2687_v18  ;;  %vm4080_vm13 = vmmov %vm4067_vm0  ;;  %v2313_v56 = vsel %vm3367_vm7, %v2311_v11, 0.0  ;;  %vm4091_vm7 = vnez %v4090_v51 }
 0x37c   :  { %2588 = vmatprep.subr.msk.bf16.mxu1 %vm4080_vm13, %v2199_v54  ;;  %vm4081_vm6 = vmmov %vm4066_vm8  ;;  %v2316_v57 = vsel %vm4085_vm2, %v2312_v53, 0.0  ;;  %v2319_v55 = vpack.c.bf16 %v2313_v56, %v2313_v56  ;;  %vm4099_vm13 = vcmask 1043456  }
 0x37d   :  { %2582 = vmatmul.mubr.msk.bf16.vlgmr.msra.gmra.mxu0 %vm4081_vm6, %v2580_v48  ;;  %vm4082_vm9 = vmmov %vm4067_vm0  ;;  %v2322_v9 = vpack.c.bf16 %v2316_v57, %v2316_v57 }
 0x37e   :  { %v2204_v4 = vsel %vm4082_vm9, %v2196_v28, 0  ;;  %2247 = vmatprep.mubr.bf16.mxu0 %v3986_v49  ;;  %vm4086_vm12 = vmmov %vm4067_vm0 }
 0x37f   :  { %2230 = vmatpush1.bf16.msra.mxu0 %v2204_v4  ;;  %vm4087_vm8 = vmmov %vm4071_vm1 }
 0x380   :  { %2591 = vmatprep.subr.msk.bf16.mxu0 %vm4086_vm12, %v2320_v19  ;;  %v2309_v59 = vsel %vm4087_vm8, %v2306_v20, %v2308_v50  ;;  %vm4088_vm0 = vmmov %vm4081_vm6 }
 0x381   :  { %2584 = vmatmul.mubr.msk.bf16.vlgmr.msra.gmra.mxu1 %vm4088_vm0, %v2580_v48  ;;  %vm4089_vm11 = vmmov %vm4072_vm4  ;;  %v2315_v8 = vsel %vm4091_vm7, %v2309_v59, 0.0 }
 0x382   :  { %v2210_v29 = vsel %vm4089_vm11, %v2198_v0, 0  ;;  %2288 = vmatprep.mubr.bf16.mxu1 %v3986_v49  ;;  %vm4092_vm1 = vmmov %vm4072_vm4  ;;  %v2321_v37 = vpack.c.bf16 %v2315_v8, %v2315_v8 }
 0x383   :  { %2271 = vmatpush1.bf16.msra.mxu1 %v2210_v29  ;;  %vm4093_vm4 = vmmov %vm4088_vm0 }
 0x384   :  { %2593 = vmatprep.subr.msk.bf16.mxu1 %vm4092_vm1, %v2322_v9  ;;  %vm4094_vm3 = vmmov %vm4092_vm1 }
 0x385   :  { %2587 = vmatmul.mubr.msk.bf16.vlgmr.msra.gmra.mxu0 %vm4093_vm4, %v2585_v38  ;;  %v2327_v7 = vsel %vm4094_vm3, %v2319_v55, 0  ;;  %vm4095_vm10 = vmmov %vm4088_vm0 }
 0x386   :  { %2353 = vmatpush1.bf16.msra.mxu0 %v2327_v7  ;;  %2370 = vmatprep.mubr.bf16.mxu0 %v3986_v49  ;;  %vm4096_vm5 = vmmov %vm4092_vm1 }
 0x387   :  { %v2333_v10 = vsel %vm4096_vm5, %v2321_v37, 0  ;;  %vm4097_vm14 = vmmov %vm4088_vm0 }
 0x388   :  { %vm4098_vm15 = vmmov %vm4088_vm0 }
 0x389   :  { %2589 = vmatmul.mubr.msk.bf16.vlgmr.msra.gmra.mxu1 %vm4095_vm10, %v2585_v38  ;;  %vm4100_vm6 = vmmov %vm4099_vm13 }
 0x38a   :  { %2394 = vmatpush1.bf16.msra.mxu1 %v2333_v10  ;;  %2411 = vmatprep.mubr.bf16.mxu1 %v3986_v49  ;;  %vm4101_vm9 = vmmov %vm4100_vm6 }
 0x38b   :  { %vm4102_vm2 = vmmov %vm4100_vm6 }
 0x38c   :  { %vm4103_vm12 = vmmov %vm4102_vm2 }
 0x38d   :  { %2592 = vmatmul.mubr.msk.bf16.vlgmr.msra.gmra.mxu0 %vm4097_vm14, %v2590_v12  ;;  %vm4104_vm8 = vmmov %vm4102_vm2 }
 0x38e   :  { %vm4105_vm0 = vmmov %vm4102_vm2 }
 0x38f   :  { %vm4106_vm11 = vmmov %vm4105_vm0 }
 0x391   :  { %2594 = vmatmul.mubr.msk.bf16.vlgmr.msra.gmra.mxu1 %vm4098_vm15, %v2590_v12 }
 0x408   :  { %v1434_v22 = vpop.f32.mrf.mxu0 }
 0x40a   :  { %v1436_v40 = vpop.f32.mrf.mxu0 }
 0x40c   :  { %v1438_v6 = vpop.f32.mrf.mxu0  ;;  %v1475_v47 = vpop.f32.mrf.mxu1 }
 0x40e   :  { %v1439_v24 = vpop.f32.mrf.mxu0  ;;  %v1477_v41 = vpop.f32.mrf.mxu1 }
 0x410   :  { %v1479_v3 = vpop.f32.mrf.mxu1 }
 0x412   :  { %v1480_v5 = vpop.f32.mrf.mxu1 }
 0x414   :  { %v1531_v2 = vpop.f32.mrf.mxu0 }
 0x415   :  { %v1532_v39 = vadd.f32 %v1531_v2, %v1434_v22 }
 0x416   :  { %v1533_v32 = vpop.f32.mrf.mxu0 }
 0x417   :  { %v1534_v57 = vadd.f32 %v1533_v32, %v1436_v40 }
 0x418   :  { %v1535_v33 = vpop.f32.mrf.mxu0  ;;  %v1572_v1 = vpop.f32.mrf.mxu1 }
 0x419   :  { %v1573_v8 = vadd.f32 %v1572_v1, %v1475_v47 }
 0x41a   :  { %v1536_v43 = vpop.f32.mrf.mxu0  ;;  %v1574_v44 = vpop.f32.mrf.mxu1 }
 0x41b   :  { %v1575_v6 = vadd.f32 %v1574_v44, %v1477_v41 }
 0x41c   :  { %v1650_v31 = vpop.f32.mrf.mxu0  ;;  %v1576_v49 = vpop.f32.mrf.mxu1 }
 0x41d   :  { %v1698_v59 = vadd.f32 %v1650_v31, %v1532_v39 }
 0x41e   :  { %v1652_v45 = vpop.f32.mrf.mxu0  ;;  %v1577_v14 = vpop.f32.mrf.mxu1 }
 0x41f   :  { %v1699_v29 = vadd.f32 %v1652_v45, %v1534_v57 }
 0x420   :  { %v1654_v52 = vpop.f32.mrf.mxu0 }
 0x421   :  { %v1691_v17 = vpop.f32.mrf.mxu1 }
 0x422   :  { %v1655_v25 = vpop.f32.mrf.mxu0  ;;  %v1700_v24 = vadd.f32 %v1691_v17, %v1573_v8 }
 0x423   :  { %v1693_v26 = vpop.f32.mrf.mxu1 }
 0x424   :  { %v1773_v60 = vpop.f32.mrf.mxu0  ;;  %v1701_v2 = vadd.f32 %v1693_v26, %v1575_v6 }
 0x425   :  { %v1695_v34 = vpop.f32.mrf.mxu1  ;;  %v1821_v38 = vadd.f32 %v1773_v60, %v1698_v59 }
 0x426   :  { %v1775_v42 = vpop.f32.mrf.mxu0 }
 0x427   :  { %v1696_v58 = vpop.f32.mrf.mxu1  ;;  %v1822_v37 = vadd.f32 %v1775_v42, %v1699_v29 }
 0x428   :  { %v1777_v20 = vpop.f32.mrf.mxu0 }
 0x429   :  { %v1814_v16 = vpop.f32.mrf.mxu1 }
 0x42a   :  { %v1778_v23 = vpop.f32.mrf.mxu0  ;;  %v1823_v43 = vadd.f32 %v1814_v16, %v1700_v24  ;;  %v2450_v24 = vld [vmem:[%s3729_s5] sm:$0xf]  ;;  %s2728_s5 = smov [#allocation2]  }
 0x42b   :  { %v1816_v35 = vpop.f32.mrf.mxu1  ;;  %s2495_s15 = sshll.u32 %s2728_s5, 4  ;;  %s2496_s15 = int_to_ptr.vmem [resolvable:$true] %s2495_s15 }
 0x42c   :  { %v1880_v62 = vpop.f32.mrf.mxu0  ;;  %v1824_v45 = vadd.f32 %v1816_v35, %v1701_v2  ;;  %s2697_s18 = scalar_lea.vmem %s2496_s15, 256  ;;  %p2702_p1 = scmp.lt.s32.totalorder %s2496_s15, %s2496_s15 }
 0x42d   :  { %v1818_v30 = vpop.f32.mrf.mxu1  ;;  %v1928_v10 = vadd.f32 %v1880_v62, %v1821_v38  ;;  %p2698_p0 = scmp.ne.s32.totalorder %s2496_s15, %s2697_s18  ;;  %p2703_p2 = scmp.lt.s32.totalorder %s2697_s18, %s2697_s18 }
 0x42e   :  { %v1882_v46 = vpop.f32.mrf.mxu0 }
 0x42f   :  { %v1819_v18 = vpop.f32.mrf.mxu1  ;;  %v1929_v5 = vadd.f32 %v1882_v46, %v1822_v37  ;;  %p2704_p3 = por %p2703_p2, %p2702_p1 }
 0x430   :  { %v1884_v27 = vpop.f32.mrf.mxu0 }
 0x431   :  { %v1921_v50 = vpop.f32.mrf.mxu1  ;;  %p2705_p4 = pnand %p2704_p3, %p2698_p0 }
 0x432   :  { %v1885_v28 = vpop.f32.mrf.mxu0  ;;  %v1930_v14 = vadd.f32 %v1921_v50, %v1823_v43 }
 0x433   :  { %v1923_v54 = vpop.f32.mrf.mxu1 }
 0x434   :  { %v2003_v36 = vpop.f32.mrf.mxu0  ;;  %v1931_v60 = vadd.f32 %v1923_v54, %v1824_v45 }
 0x435   :  { %v1925_v61 = vpop.f32.mrf.mxu1  ;;  %v2051_v33 = vadd.f32 %v2003_v36, %v1928_v10 }
 0x436   :  { %v2005_v21 = vpop.f32.mrf.mxu0 }
 0x437   :  { %v1926_v48 = vpop.f32.mrf.mxu1  ;;  %v2052_v32 = vadd.f32 %v2005_v21, %v1929_v5 }
 0x438   :  { %v2007_v13 = vpop.f32.mrf.mxu0 }
 0x439   :  { %v2044_v63 = vpop.f32.mrf.mxu1 }
 0x43a   :  { %v2008_v11 = vpop.f32.mrf.mxu0  ;;  %v2053_v34 = vadd.f32 %v2044_v63, %v1930_v14 }
 0x43b   :  { %v2046_v53 = vpop.f32.mrf.mxu1 }
 0x43c   :  { %v2054_v58 = vadd.f32 %v2046_v53, %v1931_v60 }
 0x43d   :  { %v2126_v4 = vpop.f32.mrf.mxu0  ;;  %v2048_v19 = vpop.f32.mrf.mxu1 }
 0x43e   :  { %v2174_v31 = vadd.f32 %v2126_v4, %v2051_v33  ;;  %v2463_v33 = vld [vmem:[%s3730_s6] sm:$0xf] }
 0x43f   :  { %v2128_v0 = vpop.f32.mrf.mxu0  ;;  %v2049_v56 = vpop.f32.mrf.mxu1 }
 0x440   :  { %v2175_v47 = vadd.f32 %v2128_v0, %v2052_v32 }
 0x441   :  { %v2130_v15 = vpop.f32.mrf.mxu0  ;;  %v2167_v55 = vpop.f32.mrf.mxu1 }
 0x442   :  { %v2176_v20 = vadd.f32 %v2167_v55, %v2053_v34  ;;  %v4107_v34 = vld [vmem:[#allocation5_spill] sm:$0xff] }
 0x443   :  { %v2131_v9 = vpop.f32.mrf.mxu0  ;;  %v2169_v51 = vpop.f32.mrf.mxu1 }
 0x444   :  { %v2177_v30 = vadd.f32 %v2169_v51, %v2054_v58 }
 0x445   :  { %v2249_v7 = vpop.f32.mrf.mxu0  ;;  %v2171_v12 = vpop.f32.mrf.mxu1 }
 0x446   :  { %v2297_v1 = vadd.f32 %v2249_v7, %v2174_v31 }
 0x447   :  { %v2251_v3 = vpop.f32.mrf.mxu0  ;;  %v2172_v22 = vpop.f32.mrf.mxu1 }
 0x448   :  { %v2298_v44 = vadd.f32 %v2251_v3, %v2175_v47 }
 0x449   :  { %v2253_v40 = vpop.f32.mrf.mxu0  ;;  %v2290_v49 = vpop.f32.mrf.mxu1 }
 0x44a   :  { %v2299_v46 = vadd.f32 %v2290_v49, %v2176_v20 }
 0x44b   :  { %v2254_v52 = vpop.f32.mrf.mxu0  ;;  %v2292_v25 = vpop.f32.mrf.mxu1 }
 0x44c   :  { %v2300_v54 = vadd.f32 %v2292_v25, %v2177_v30  ;;  %v2695_v25 = vld [vmem:[%s3724_s0] sm:$0xff] }
 0x44d   :  { %v2372_v41 = vpop.f32.mrf.mxu0  ;;  %v2294_v17 = vpop.f32.mrf.mxu1 }
 0x44e   :  { %v2420_v42 = vadd.f32 %v2372_v41, %v2297_v1 }
 0x44f   :  { %v2374_v26 = vpop.f32.mrf.mxu0  ;;  %v2295_v23 = vpop.f32.mrf.mxu1 }
 0x450   :  { %v2434_v16 = vmul.f32 %v2420_v42, %v2420_v42  ;;  %v2421_v62 = vadd.f32 %v2374_v26, %v2298_v44  ;;  %v2424_v18 = vsel %vm4099_vm13, %v2420_v42, 0.0  ;;  %v2696_v44 = vld [vmem:[%s3724_s0 + $0x8] sm:$0xff] }
 0x451   :  { %v2376_v35 = vpop.f32.mrf.mxu0  ;;  %v2413_v28 = vpop.f32.mrf.mxu1 }
 0x452   :  { %v2425_v27 = vsel %vm4100_vm6, %v2421_v62, 0.0  ;;  %v2435_v50 = vmul.f32 %v2421_v62, %v2421_v62  ;;  %v2422_v36 = vadd.f32 %v2413_v28, %v2299_v46  ;;  %v2438_v13 = vsel %vm4101_vm9, %v2434_v16, 0.0 }
 0x453   :  { %v2377_v61 = vpop.f32.mrf.mxu0  ;;  %v2426_v21 = vadd.f32 %v2425_v27, %v2424_v18  ;;  %v2415_v48 = vpop.f32.mrf.mxu1 }
 0x454   :  { %v2439_v63 = vsel %vm4102_vm2, %v2435_v50, 0.0  ;;  %v2436_v11 = vmul.f32 %v2422_v36, %v2422_v36  ;;  %v2423_v53 = vadd.f32 %v2415_v48, %v2300_v54  ;;  %v2427_v4 = vsel %vm4103_vm12, %v2422_v36, 0.0 }
 0x455   :  { %v2440_v19 = vadd.f32 %v2439_v63, %v2438_v13  ;;  %v2417_v0 = vpop.f32.mrf.mxu1  ;;  %v2428_v39 = vadd.f32 %v2427_v4, %v2426_v21 }
 0x456   :  { %v2429_v56 = vsel %vm4104_vm8, %v2423_v53, 0.0  ;;  %v2437_v15 = vmul.f32 %v2423_v53, %v2423_v53  ;;  %v2441_v57 = vsel %vm4105_vm0, %v2436_v11, 0.0 }
 0x457   :  { %v2418_v59 = vpop.f32.mrf.mxu1  ;;  %v2430_v55 = vadd.f32 %v2429_v56, %v2428_v39  ;;  %v2442_v9 = vadd.f32 %v2441_v57, %v2440_v19 }
 0x458   :  { %v2443_v29 = vsel %vm4106_vm11, %v2437_v15, 0.0 }
 0x459   :  { %2431 = vadd.xlane.f32.xlu0 %v2430_v55  ;;  %v2444_v38 = vadd.f32 %v2443_v29, %v2442_v9 }
 0x45b   :  { %2445 = vadd.xlane.f32.xlu1 %v2444_v38 }
 0x4e2   :  { %v2432_v51 = vpop.xlane.xlu0 %2431 }
 0x4e3   :  { %v2433_v8 = vmul.f32 0.001953125, %v2432_v51 }
 0x4e4   :  { %v2446_v7 = vpop.xlane.xlu1 %2445 }
 0x4e5   :  { %v2448_v37 = vmul.f32 %v2433_v8, %v2433_v8  ;;  %v2447_v10 = vmul.f32 0.001953125, %v2446_v7 }
 0x4e7   :  { %v2449_v12 = vsub.f32 %v2447_v10, %v2448_v37 }
 0x4e9   :  { %v2451_v6 = vadd.f32 1e-05, %v2449_v12 }
 0x4eb   :  { %2693 = vrsqrt.f32 %v2451_v6 }
 0x4f8   :  { %v2694_v3 = vpop.eup %2693 }
 0x4f9   :  { %v2453_v5 = vmul.f32 %v2694_v3, %v2450_v24 }
 0x4fb   :  { %2456 = vperm.xlu0 %2647, %v2453_v5   ;;  %v2464_v22 = vmul.f32 %v2453_v5, %v2433_v8 }
 0x4fd   :  { %v2465_v2 = vsub.f32 %v2463_v33, %v2464_v22 }
 0x4ff   :  { %2468 = vperm.xlu1 %2648, %v2465_v2  }
 0x576   :  { %v2457_v43 = vpop.permute.xlu0 %2456 }
 0x577   :  { %v2459_v40 = vmul.f32 %v2457_v43, %v2420_v42  ;;  %v2460_v32 = vmul.f32 %v2457_v43, %v2421_v62  ;;  %v2461_v31 = vmul.f32 %v2457_v43, %v2422_v36  ;;  %v2462_v49 = vmul.f32 %v2457_v43, %v2423_v53  ;;  %v4108_v42 = vld [vmem:[#allocation6_spill] sm:$0xff] }
 0x57a   :  { %v2469_v45 = vpop.permute.xlu1 %2468 }
 0x57b   :  { %v2471_v14 = vadd.f32 %v2469_v45, %v2459_v40  ;;  %v2472_v52 = vadd.f32 %v2469_v45, %v2460_v32  ;;  %v2473_v47 = vadd.f32 %v2469_v45, %v2461_v31  ;;  %v2474_v1 = vadd.f32 %v2469_v45, %v2462_v49 }
 0x57d   :  { %v2475_v60 = vadd.f32 %v2695_v25, %v2471_v14  ;;  %v2476_v41 = vadd.f32 %v2472_v52, %v4107_v34  ;;  %v2477_v17 = vadd.f32 %v2696_v44, %v2473_v47  ;;  %v2478_v58 = vadd.f32 %v2474_v1, %v4108_v42 }
 0x57f   :  { %v2481_v20 = vcombine.low %v2475_v60, %v2476_v41  ;;  %v2486_v26 = vcombine.low %v2477_v17, %v2478_v58 }
 0x581   :  { %2483 = vst [vmem:[#allocation2] sm:$0xff] %v2481_v20  ;;  %2489 = vst [vmem:[#allocation2 + $0x8] sm:$0xff] %v2486_v26 }
 0x582   :  { %2708 = shalt.err (!%p2705_p4)
}
 0x583   :  { %s2729_s2 = smov 128   ;;  %s2730_s3 = smov 8  }
 0x584   :  { %2501 = dma.vmem_to_hbm [thread:$0]  %s2496_s15, 256, %s3731_s7, [#allocation3], %s2729_s2, %s2729_s2, %s2730_s3  }
 0x585   :  { %2717 = dma.done.wait [#allocation3], 256  }
 0x586   :  { %2718 = vsyncadd [#allocation3], 4294967040 }
 0x587   :  { %2505 = vsyncpa [#allocation3], 1 }

</bundles_post_ra>
